<compile_context>
chip_gen: v5e
topology: v5e:2x2
jax: 0.10.0
libtpu: 0.0.40
codegen_flags: <defaults>
</compile_context>

<pallas_src>
import functools

import jax
import jax.numpy as jnp
from jax.experimental import pallas as pl
from jax.experimental.pallas import tpu as pltpu

# ----------------------------- small config (scaled-down module) -----------------------------
VOCAB_SIZE = 128          # lane-dense lm_head output
HIDDEN_SIZE = 32
INTERMEDIATE_SIZE = 64
NUM_HEADS = 4
HEAD_DIM = HIDDEN_SIZE // NUM_HEADS     # 8 (even, required for rotary)
NUM_LAYERS = 2
BATCH = 2
SEQ_LEN = 8
EPS = 1e-8

_VMEM = pl.BlockSpec(memory_space=pltpu.MemorySpace.VMEM)


# ---------------------------------------- fused kernel ---------------------------------------
def _tr_forward_kernel(
    ids_ref,        # (B*S, 1)     int32
    emb_ext_ref,    # (V, 2H)      [emb | emb @ P]
    trig_ref,       # (4, B*S, H)  [cos_emb, sin_emb(signed), cos_qk, sin_qk(signed)]
    wqkv_ref,       # (L, H, 5H)   [Wq*s | Wk | Wv | (Wq*s)@P | Wk@P]
    wo_ref,         # (L, H, H)
    w1_ref,         # (L, H, I)
    w2_ref,         # (L, I, H)
    norms_ref,      # (2L+1, 1, H) [rms1_0, rms2_0, rms1_1, rms2_1, ..., final_norm]
    lm_head_ref,    # (H, V)
    out_ref,        # (B*S, V)
    *, num_layers, num_heads, head_dim, seq_len, batch, eps,
):
    f32 = jnp.float32
    H = num_heads * head_dim
    BS = batch * seq_len
    V = emb_ext_ref.shape[0]

    # ---- embedding lookup (+ pair-swapped copy) via ONE one-hot matmul ----
    ids = ids_ref[...]                                              # (BS, 1) int32
    vocab_iota = jax.lax.broadcasted_iota(jnp.int32, (BS, V), 1)    # (BS, V)
    one_hot = (vocab_iota == ids).astype(f32)
    xx = jnp.dot(one_hot, emb_ext_ref[...], preferred_element_type=f32)   # (BS, 2H)

    cos_e = trig_ref[0]
    sin_e = trig_ref[1]
    cos_r = trig_ref[2]
    sin_r = trig_ref[3]

    # rotary on embeddings: x*cos + (x@P)*sin_signed, swap columns already in emb_ext
    x = xx[:, :H] * cos_e + xx[:, H:] * sin_e                       # (BS, H)

    def rmsnorm(y, g):
        # reference: y / (sqrt(mean(y^2)) + eps) * g   (eps outside sqrt)
        rms = jnp.sqrt(jnp.mean(y * y, axis=-1, keepdims=True))
        return y * pl.reciprocal(rms + eps, approx=False) * g

    def to_heads(t):
        # (BS, H) -> (num_heads*batch, S, head_dim); only lane slices at multiples of
        # head_dim, a leading-axis stack and a tile-aligned reshape (no (8,8) loop).
        parts = [t[:, h * head_dim:(h + 1) * head_dim] for h in range(num_heads)]
        return jnp.stack(parts, axis=0).reshape(num_heads * batch, seq_len, head_dim)

    def from_heads(t):
        # (num_heads*batch, S, head_dim) -> (BS, H); leading slices + one lane concat.
        parts = [t[h * batch:(h + 1) * batch].reshape(BS, head_dim)
                 for h in range(num_heads)]
        return jnp.concatenate(parts, axis=1)

    for l in range(num_layers):
        # ---- fused QKV (+ swapped q/k) projection: one MXU push ----
        qkv = jnp.dot(x, wqkv_ref[l], preferred_element_type=f32)   # (BS, 5H)
        # rotary on q/k; softmax scale is pre-folded into the Wq columns
        q = qkv[:, 0:H] * cos_r + qkv[:, 3 * H:4 * H] * sin_r
        k = qkv[:, H:2 * H] * cos_r + qkv[:, 4 * H:5 * H] * sin_r
        v = qkv[:, 2 * H:3 * H]

        # ---- attention: two batched matmuls + one batched softmax; no mask ----
        q3 = to_heads(q)                                            # (nh*B, S, hd)
        k3 = to_heads(k)
        v3 = to_heads(v)
        s = jnp.einsum('bqd,bkd->bqk', q3, k3,
                       preferred_element_type=f32)                  # (nh*B, S, S)
        s = s - jnp.max(s, axis=-1, keepdims=True)
        p = jnp.exp(s)
        p = p * pl.reciprocal(jnp.sum(p, axis=-1, keepdims=True), approx=True)
        o3 = jnp.einsum('bqk,bkd->bqd', p, v3,
                        preferred_element_type=f32)                 # (nh*B, S, hd)

        attn = jnp.dot(from_heads(o3), wo_ref[l], preferred_element_type=f32)

        # residual + RMSNorm
        x = rmsnorm(x + attn, norms_ref[2 * l])

        # ---- FFN: linear -> exact (erf) GELU -> linear ----
        hmid = jnp.dot(x, w1_ref[l], preferred_element_type=f32)    # (BS, I)
        hmid = 0.5 * hmid * (1.0 + jax.lax.erf(hmid * 0.7071067811865476))
        ffn = jnp.dot(hmid, w2_ref[l], preferred_element_type=f32)

        x = rmsnorm(x + ffn, norms_ref[2 * l + 1])

    # ---- final RMSNorm + lm_head: lane-dense (BS, 128) output, the only HBM write ----
    x = rmsnorm(x, norms_ref[2 * num_layers])
    out_ref[...] = jnp.dot(x, lm_head_ref[...], preferred_element_type=f32)


# ------------------------------- host-side constant tables -----------------------------------
def _swap_matrix(hidden):
    """Permutation matrix P with P[i, i^1] = 1 (even/odd pair swap)."""
    idx = jnp.arange(hidden)
    return ((idx[:, None] ^ 1) == idx[None, :]).astype(jnp.float32)


def _rotary_tables(batch, seq_len, hidden, head_dim, num_heads):
    """(4, B*S, H) packed cos / signed-sin tables for both rotary applications."""
    inv_freq = 1.0 / (10000.0 ** (jnp.arange(0, head_dim, 2, dtype=jnp.float32) / head_dim))
    pos = jnp.arange(seq_len, dtype=jnp.float32)
    freqs = pos[:, None] * inv_freq[None, :]                        # (S, hd//2)
    cos_d = jnp.repeat(jnp.cos(freqs), 2, axis=-1)                  # (S, hd) duplicated pairs
    sin_d = jnp.repeat(jnp.sin(freqs), 2, axis=-1)
    sign = jnp.tile(jnp.array([-1.0, 1.0], jnp.float32), (head_dim // 2,))
    sin_s = sin_d * sign[None, :]                                   # signed sin

    # embedding rotary: only the first head_dim lanes rotate; rest is identity
    cos_emb = jnp.concatenate(
        [cos_d, jnp.ones((seq_len, hidden - head_dim), jnp.float32)], axis=-1)
    sin_emb = jnp.concatenate(
        [sin_s, jnp.zeros((seq_len, hidden - head_dim), jnp.float32)], axis=-1)

    # q/k rotary: same pattern repeated across every head's lane group
    cos_qk = jnp.tile(cos_d, (1, num_heads))
    sin_qk = jnp.tile(sin_s, (1, num_heads))

    tile_b = lambda t: jnp.tile(t, (batch, 1))                      # rows are b*S + s
    return jnp.stack([tile_b(cos_emb), tile_b(sin_emb), tile_b(cos_qk), tile_b(sin_qk)])


# -------------------------------------- parameters & forward ---------------------------------
def init_params(key):
    ks = jax.random.split(key, 8)
    n = lambda k, shape: 0.02 * jax.random.normal(k, shape, jnp.float32)
    return {
        "embedding": n(ks[0], (VOCAB_SIZE, HIDDEN_SIZE)),
        "lm_head": n(ks[1], (HIDDEN_SIZE, VOCAB_SIZE)),
        "wq": n(ks[2], (NUM_LAYERS, HIDDEN_SIZE, HIDDEN_SIZE)),
        "wk": n(ks[3], (NUM_LAYERS, HIDDEN_SIZE, HIDDEN_SIZE)),
        "wv": n(ks[4], (NUM_LAYERS, HIDDEN_SIZE, HIDDEN_SIZE)),
        "wo": n(ks[5], (NUM_LAYERS, HIDDEN_SIZE, HIDDEN_SIZE)),
        "w1": n(ks[6], (NUM_LAYERS, HIDDEN_SIZE, INTERMEDIATE_SIZE)),
        "w2": n(ks[7], (NUM_LAYERS, INTERMEDIATE_SIZE, HIDDEN_SIZE)),
        "rms1": jnp.ones((NUM_LAYERS, HIDDEN_SIZE), jnp.float32),
        "rms2": jnp.ones((NUM_LAYERS, HIDDEN_SIZE), jnp.float32),
        "norm": jnp.ones((HIDDEN_SIZE,), jnp.float32),
    }


def prepare_inputs(params, batch, seq_len):
    """One-time host-side folding (done OUTSIDE the per-token forward):
    pair-swap permutation and softmax scale folded into weight columns; rotary tables
    and RMSNorm scales packed so the kernel takes 9 inputs instead of 15."""
    P = _swap_matrix(HIDDEN_SIZE)
    scale = HEAD_DIM ** -0.5

    emb = params["embedding"]
    emb_ext = jnp.concatenate([emb, emb @ P], axis=1)               # (V, 2H)

    wq_s = params["wq"] * scale                                     # fold softmax scale
    wqkv_ext = jnp.concatenate(
        [wq_s, params["wk"], params["wv"], wq_s @ P, params["wk"] @ P], axis=2)  # (L, H, 5H)

    norms = jnp.concatenate(
        [jnp.stack([params["rms1"], params["rms2"]], axis=1).reshape(
            2 * NUM_LAYERS, HIDDEN_SIZE),
         params["norm"][None, :]], axis=0)[:, None, :]              # (2L+1, 1, H)

    trig = _rotary_tables(batch, seq_len, HIDDEN_SIZE, HEAD_DIM, NUM_HEADS)  # (4, BS, H)

    return {
        "emb_ext": emb_ext, "trig": trig, "wqkv_ext": wqkv_ext,
        "wo": params["wo"], "w1": params["w1"], "w2": params["w2"],
        "norms": norms, "lm_head": params["lm_head"],
    }


def tr_for_causal_lm_forward(prep, input_ids):
    """Returns logits of shape (B, S, vocab_size). attention_mask=None, labels=None."""
    B, S = input_ids.shape
    BS = B * S
    ids2d = input_ids.reshape(BS, 1).astype(jnp.int32)

    kernel = functools.partial(
        _tr_forward_kernel,
        num_layers=NUM_LAYERS, num_heads=NUM_HEADS, head_dim=HEAD_DIM,
        seq_len=S, batch=B, eps=EPS)

    logits2d = pl.pallas_call(
        kernel,
        out_shape=jax.ShapeDtypeStruct((BS, VOCAB_SIZE), jnp.float32),
        in_specs=[_VMEM] * 9,
        out_specs=_VMEM,
    )(
        ids2d, prep["emb_ext"], prep["trig"], prep["wqkv_ext"],
        prep["wo"], prep["w1"], prep["w2"], prep["norms"], prep["lm_head"],
    )
    # TODO(synk): cross-entropy loss branch (labels is not None) and the
    # hidden_states/attentions outputs are not implemented; logits only.
    return logits2d.reshape(B, S, VOCAB_SIZE)


if __name__ == "__main__":
    key = jax.random.PRNGKey(0)
    pkey, ikey = jax.random.split(key)
    params = init_params(pkey)
    prep = prepare_inputs(params, BATCH, SEQ_LEN)     # one-time host-side fold/pack
    input_ids = jax.random.randint(ikey, (BATCH, SEQ_LEN), 0, VOCAB_SIZE, dtype=jnp.int32)

    logits = jax.jit(tr_for_causal_lm_forward)(prep, input_ids)
    logits = jax.block_until_ready(logits)

    assert logits.shape == (BATCH, SEQ_LEN, VOCAB_SIZE)
    assert bool(jnp.all(jnp.isfinite(logits)))
    print("KERNEL_OK")
</pallas_src>

<mosaic_0001>
module attributes {stable_mosaic.version = 11 : i64} {
  func.func @_tr_forward_kernel(%arg0: memref<16x1xi32, #tpu.memory_space<vmem>>, %arg1: memref<128x64xf32, #tpu.memory_space<vmem>>, %arg2: memref<4x16x32xf32, #tpu.memory_space<vmem>>, %arg3: memref<2x32x160xf32, #tpu.memory_space<vmem>>, %arg4: memref<2x32x32xf32, #tpu.memory_space<vmem>>, %arg5: memref<2x32x64xf32, #tpu.memory_space<vmem>>, %arg6: memref<2x64x32xf32, #tpu.memory_space<vmem>>, %arg7: memref<5x1x32xf32, #tpu.memory_space<vmem>>, %arg8: memref<32x128xf32, #tpu.memory_space<vmem>>, %arg9: memref<16x128xf32, #tpu.memory_space<vmem>>) attributes {dimension_semantics = [], scalar_prefetch = 0 : i64, scratch_operands = 0 : i64, tpu.core_type = #tpu.core_type<tc>} {
    %c0 = arith.constant 0 : index
    %c0_0 = arith.constant 0 : index
    %0 = vector.load %arg0[%c0, %c0_0] : memref<16x1xi32, #tpu.memory_space<vmem>>, vector<16x1xi32>
    %1 = tpu.iota {dimensions = array<i32: 1>} : vector<16x128xi32>
    %2 = vector.broadcast %0 : vector<16x1xi32> to vector<16x128xi32>
    %3 = arith.cmpi eq, %1, %2 : vector<16x128xi32>
    %4 = arith.extui %3 : vector<16x128xi1> to vector<16x128xi32>
    %5 = arith.sitofp %4 : vector<16x128xi32> to vector<16x128xf32>
    %c0_1 = arith.constant 0 : index
    %c0_2 = arith.constant 0 : index
    %6 = vector.load %arg1[%c0_1, %c0_2] : memref<128x64xf32, #tpu.memory_space<vmem>>, vector<128x64xf32>
    %cst = arith.constant dense<0.000000e+00> : vector<16x64xf32>
    %7 = tpu.matmul %5, %6, %cst {dimension_numbers = #tpu.dot_dimension_numbers<[1], [0], [0], [1], [0, 0, 1, 1], [], []>} : vector<16x128xf32>, vector<128x64xf32>, vector<16x64xf32> -> vector<16x64xf32>
    %c0_3 = arith.constant 0 : index
    %c0_4 = arith.constant 0 : index
    %c0_5 = arith.constant 0 : index
    %8 = vector.load %arg2[%c0_3, %c0_4, %c0_5] : memref<4x16x32xf32, #tpu.memory_space<vmem>>, vector<1x16x32xf32>
    %9 = vector.shape_cast %8 : vector<1x16x32xf32> to vector<16x32xf32>
    %c1 = arith.constant 1 : index
    %c0_6 = arith.constant 0 : index
    %c0_7 = arith.constant 0 : index
    %10 = vector.load %arg2[%c1, %c0_6, %c0_7] : memref<4x16x32xf32, #tpu.memory_space<vmem>>, vector<1x16x32xf32>
    %11 = vector.shape_cast %10 : vector<1x16x32xf32> to vector<16x32xf32>
    %c2 = arith.constant 2 : index
    %c0_8 = arith.constant 0 : index
    %c0_9 = arith.constant 0 : index
    %12 = vector.load %arg2[%c2, %c0_8, %c0_9] : memref<4x16x32xf32, #tpu.memory_space<vmem>>, vector<1x16x32xf32>
    %13 = vector.shape_cast %12 : vector<1x16x32xf32> to vector<16x32xf32>
    %c3 = arith.constant 3 : index
    %c0_10 = arith.constant 0 : index
    %c0_11 = arith.constant 0 : index
    %14 = vector.load %arg2[%c3, %c0_10, %c0_11] : memref<4x16x32xf32, #tpu.memory_space<vmem>>, vector<1x16x32xf32>
    %15 = vector.shape_cast %14 : vector<1x16x32xf32> to vector<16x32xf32>
    %16 = vector.extract_strided_slice %7 {offsets = [0, 0], sizes = [16, 32], strides = [1, 1]} : vector<16x64xf32> to vector<16x32xf32>
    %17 = arith.mulf %16, %9 : vector<16x32xf32>
    %18 = vector.extract_strided_slice %7 {offsets = [0, 32], sizes = [16, 32], strides = [1, 1]} : vector<16x64xf32> to vector<16x32xf32>
    %19 = arith.mulf %18, %11 : vector<16x32xf32>
    %20 = arith.addf %17, %19 : vector<16x32xf32>
    %c0_12 = arith.constant 0 : index
    %c0_13 = arith.constant 0 : index
    %c0_14 = arith.constant 0 : index
    %21 = vector.load %arg3[%c0_12, %c0_13, %c0_14] : memref<2x32x160xf32, #tpu.memory_space<vmem>>, vector<1x32x160xf32>
    %22 = vector.shape_cast %21 : vector<1x32x160xf32> to vector<32x160xf32>
    %cst_15 = arith.constant dense<0.000000e+00> : vector<16x160xf32>
    %23 = tpu.matmul %20, %22, %cst_15 {dimension_numbers = #tpu.dot_dimension_numbers<[1], [0], [0], [1], [0, 0, 1, 1], [], []>} : vector<16x32xf32>, vector<32x160xf32>, vector<16x160xf32> -> vector<16x160xf32>
    %24 = vector.extract_strided_slice %23 {offsets = [0, 0], sizes = [16, 32], strides = [1, 1]} : vector<16x160xf32> to vector<16x32xf32>
    %25 = arith.mulf %24, %13 : vector<16x32xf32>
    %26 = vector.extract_strided_slice %23 {offsets = [0, 96], sizes = [16, 32], strides = [1, 1]} : vector<16x160xf32> to vector<16x32xf32>
    %27 = arith.mulf %26, %15 : vector<16x32xf32>
    %28 = arith.addf %25, %27 : vector<16x32xf32>
    %29 = vector.extract_strided_slice %23 {offsets = [0, 32], sizes = [16, 32], strides = [1, 1]} : vector<16x160xf32> to vector<16x32xf32>
    %30 = arith.mulf %29, %13 : vector<16x32xf32>
    %31 = vector.extract_strided_slice %23 {offsets = [0, 128], sizes = [16, 32], strides = [1, 1]} : vector<16x160xf32> to vector<16x32xf32>
    %32 = arith.mulf %31, %15 : vector<16x32xf32>
    %33 = arith.addf %30, %32 : vector<16x32xf32>
    %34 = vector.extract_strided_slice %23 {offsets = [0, 64], sizes = [16, 32], strides = [1, 1]} : vector<16x160xf32> to vector<16x32xf32>
    %35 = vector.extract_strided_slice %28 {offsets = [0, 0], sizes = [16, 8], strides = [1, 1]} : vector<16x32xf32> to vector<16x8xf32>
    %36 = vector.extract_strided_slice %28 {offsets = [0, 8], sizes = [16, 8], strides = [1, 1]} : vector<16x32xf32> to vector<16x8xf32>
    %37 = vector.extract_strided_slice %28 {offsets = [0, 16], sizes = [16, 8], strides = [1, 1]} : vector<16x32xf32> to vector<16x8xf32>
    %38 = vector.extract_strided_slice %28 {offsets = [0, 24], sizes = [16, 8], strides = [1, 1]} : vector<16x32xf32> to vector<16x8xf32>
    %39 = vector.shape_cast %35 : vector<16x8xf32> to vector<1x16x8xf32>
    %40 = vector.shape_cast %36 : vector<16x8xf32> to vector<1x16x8xf32>
    %41 = vector.shape_cast %37 : vector<16x8xf32> to vector<1x16x8xf32>
    %42 = vector.shape_cast %38 : vector<16x8xf32> to vector<1x16x8xf32>
    %43 = tpu.concatenate %39, %40, %41, %42 in 0 : vector<1x16x8xf32>, vector<1x16x8xf32>, vector<1x16x8xf32>, vector<1x16x8xf32> -> vector<4x16x8xf32>
    %44 = vector.shape_cast %43 : vector<4x16x8xf32> to vector<8x8x8xf32>
    %45 = vector.extract_strided_slice %33 {offsets = [0, 0], sizes = [16, 8], strides = [1, 1]} : vector<16x32xf32> to vector<16x8xf32>
    %46 = vector.extract_strided_slice %33 {offsets = [0, 8], sizes = [16, 8], strides = [1, 1]} : vector<16x32xf32> to vector<16x8xf32>
    %47 = vector.extract_strided_slice %33 {offsets = [0, 16], sizes = [16, 8], strides = [1, 1]} : vector<16x32xf32> to vector<16x8xf32>
    %48 = vector.extract_strided_slice %33 {offsets = [0, 24], sizes = [16, 8], strides = [1, 1]} : vector<16x32xf32> to vector<16x8xf32>
    %49 = vector.shape_cast %45 : vector<16x8xf32> to vector<1x16x8xf32>
    %50 = vector.shape_cast %46 : vector<16x8xf32> to vector<1x16x8xf32>
    %51 = vector.shape_cast %47 : vector<16x8xf32> to vector<1x16x8xf32>
    %52 = vector.shape_cast %48 : vector<16x8xf32> to vector<1x16x8xf32>
    %53 = tpu.concatenate %49, %50, %51, %52 in 0 : vector<1x16x8xf32>, vector<1x16x8xf32>, vector<1x16x8xf32>, vector<1x16x8xf32> -> vector<4x16x8xf32>
    %54 = vector.shape_cast %53 : vector<4x16x8xf32> to vector<8x8x8xf32>
    %55 = vector.extract_strided_slice %34 {offsets = [0, 0], sizes = [16, 8], strides = [1, 1]} : vector<16x32xf32> to vector<16x8xf32>
    %56 = vector.extract_strided_slice %34 {offsets = [0, 8], sizes = [16, 8], strides = [1, 1]} : vector<16x32xf32> to vector<16x8xf32>
    %57 = vector.extract_strided_slice %34 {offsets = [0, 16], sizes = [16, 8], strides = [1, 1]} : vector<16x32xf32> to vector<16x8xf32>
    %58 = vector.extract_strided_slice %34 {offsets = [0, 24], sizes = [16, 8], strides = [1, 1]} : vector<16x32xf32> to vector<16x8xf32>
    %59 = vector.shape_cast %55 : vector<16x8xf32> to vector<1x16x8xf32>
    %60 = vector.shape_cast %56 : vector<16x8xf32> to vector<1x16x8xf32>
    %61 = vector.shape_cast %57 : vector<16x8xf32> to vector<1x16x8xf32>
    %62 = vector.shape_cast %58 : vector<16x8xf32> to vector<1x16x8xf32>
    %63 = tpu.concatenate %59, %60, %61, %62 in 0 : vector<1x16x8xf32>, vector<1x16x8xf32>, vector<1x16x8xf32>, vector<1x16x8xf32> -> vector<4x16x8xf32>
    %64 = vector.shape_cast %63 : vector<4x16x8xf32> to vector<8x8x8xf32>
    "tpu.trace_start"() <{level = 10 : i32, message = "bqd,bkd->bqk"}> : () -> ()
    %cst_16 = arith.constant dense<0.000000e+00> : vector<8x8x8xf32>
    %65 = tpu.matmul %44, %54, %cst_16 {dimension_numbers = #tpu.dot_dimension_numbers<[2], [2], [1], [1], [0, 0, 0, 1, 1, 1], [0], [0]>} : vector<8x8x8xf32>, vector<8x8x8xf32>, vector<8x8x8xf32> -> vector<8x8x8xf32>
    "tpu.trace_stop"() : () -> ()
    %cst_17 = arith.constant dense<0xFF800000> : vector<8x8xf32>
    %66 = vector.multi_reduction <maximumf>, %65, %cst_17 [2] : vector<8x8x8xf32> to vector<8x8xf32>
    %67 = vector.shape_cast %66 : vector<8x8xf32> to vector<8x8x1xf32>
    %68 = vector.broadcast %67 : vector<8x8x1xf32> to vector<8x8x8xf32>
    %69 = arith.subf %65, %68 : vector<8x8x8xf32>
    %70 = math.exp %69 : vector<8x8x8xf32>
    %cst_18 = arith.constant dense<0.000000e+00> : vector<8x8xf32>
    %71 = vector.multi_reduction <add>, %70, %cst_18 [2] : vector<8x8x8xf32> to vector<8x8xf32>
    %72 = vector.shape_cast %71 : vector<8x8xf32> to vector<8x8x1xf32>
    %73 = tpu.reciprocal %72 {approx = true} : vector<8x8x1xf32> -> vector<8x8x1xf32>
    %74 = vector.broadcast %73 : vector<8x8x1xf32> to vector<8x8x8xf32>
    %75 = arith.mulf %70, %74 : vector<8x8x8xf32>
    "tpu.trace_start"() <{level = 10 : i32, message = "bqk,bkd->bqd"}> : () -> ()
    %cst_19 = arith.constant dense<0.000000e+00> : vector<8x8x8xf32>
    %76 = tpu.matmul %75, %64, %cst_19 {dimension_numbers = #tpu.dot_dimension_numbers<[2], [1], [1], [2], [0, 0, 0, 1, 1, 2], [0], [0]>} : vector<8x8x8xf32>, vector<8x8x8xf32>, vector<8x8x8xf32> -> vector<8x8x8xf32>
    "tpu.trace_stop"() : () -> ()
    %77 = vector.extract_strided_slice %76 {offsets = [0, 0, 0], sizes = [2, 8, 8], strides = [1, 1, 1]} : vector<8x8x8xf32> to vector<2x8x8xf32>
    %78 = vector.shape_cast %77 : vector<2x8x8xf32> to vector<16x8xf32>
    %79 = vector.extract_strided_slice %76 {offsets = [2, 0, 0], sizes = [2, 8, 8], strides = [1, 1, 1]} : vector<8x8x8xf32> to vector<2x8x8xf32>
    %80 = vector.shape_cast %79 : vector<2x8x8xf32> to vector<16x8xf32>
    %81 = vector.extract_strided_slice %76 {offsets = [4, 0, 0], sizes = [2, 8, 8], strides = [1, 1, 1]} : vector<8x8x8xf32> to vector<2x8x8xf32>
    %82 = vector.shape_cast %81 : vector<2x8x8xf32> to vector<16x8xf32>
    %83 = vector.extract_strided_slice %76 {offsets = [6, 0, 0], sizes = [2, 8, 8], strides = [1, 1, 1]} : vector<8x8x8xf32> to vector<2x8x8xf32>
    %84 = vector.shape_cast %83 : vector<2x8x8xf32> to vector<16x8xf32>
    %85 = tpu.concatenate %78, %80, %82, %84 in 1 : vector<16x8xf32>, vector<16x8xf32>, vector<16x8xf32>, vector<16x8xf32> -> vector<16x32xf32>
    %c0_20 = arith.constant 0 : index
    %c0_21 = arith.constant 0 : index
    %c0_22 = arith.constant 0 : index
    %86 = vector.load %arg4[%c0_20, %c0_21, %c0_22] : memref<2x32x32xf32, #tpu.memory_space<vmem>>, vector<1x32x32xf32>
    %87 = vector.shape_cast %86 : vector<1x32x32xf32> to vector<32x32xf32>
    %cst_23 = arith.constant dense<0.000000e+00> : vector<16x32xf32>
    %88 = tpu.matmul %85, %87, %cst_23 {dimension_numbers = #tpu.dot_dimension_numbers<[1], [0], [0], [1], [0, 0, 1, 1], [], []>} : vector<16x32xf32>, vector<32x32xf32>, vector<16x32xf32> -> vector<16x32xf32>
    %89 = arith.addf %20, %88 : vector<16x32xf32>
    %c0_24 = arith.constant 0 : index
    %c0_25 = arith.constant 0 : index
    %c0_26 = arith.constant 0 : index
    %90 = vector.load %arg7[%c0_24, %c0_25, %c0_26] : memref<5x1x32xf32, #tpu.memory_space<vmem>>, vector<1x1x32xf32>
    %91 = vector.shape_cast %90 : vector<1x1x32xf32> to vector<1x32xf32>
    %92 = arith.mulf %89, %89 : vector<16x32xf32>
    %cst_27 = arith.constant dense<0.000000e+00> : vector<16xf32>
    %93 = vector.multi_reduction <add>, %92, %cst_27 [1] : vector<16x32xf32> to vector<16xf32>
    %94 = vector.shape_cast %93 : vector<16xf32> to vector<16x1xf32>
    %cst_28 = arith.constant 3.200000e+01 : f32
    %95 = vector.broadcast %cst_28 : f32 to vector<16x1xf32>
    %96 = arith.divf %94, %95 : vector<16x1xf32>
    %97 = math.sqrt %96 : vector<16x1xf32>
    %cst_29 = arith.constant 9.99999993E-9 : f32
    %98 = vector.broadcast %cst_29 : f32 to vector<16x1xf32>
    %99 = arith.addf %97, %98 : vector<16x1xf32>
    %100 = tpu.reciprocal %99 : vector<16x1xf32> -> vector<16x1xf32>
    %101 = vector.broadcast %100 : vector<16x1xf32> to vector<16x32xf32>
    %102 = arith.mulf %89, %101 : vector<16x32xf32>
    %103 = vector.broadcast %91 : vector<1x32xf32> to vector<16x32xf32>
    %104 = arith.mulf %102, %103 : vector<16x32xf32>
    %c0_30 = arith.constant 0 : index
    %c0_31 = arith.constant 0 : index
    %c0_32 = arith.constant 0 : index
    %105 = vector.load %arg5[%c0_30, %c0_31, %c0_32] : memref<2x32x64xf32, #tpu.memory_space<vmem>>, vector<1x32x64xf32>
    %106 = vector.shape_cast %105 : vector<1x32x64xf32> to vector<32x64xf32>
    %cst_33 = arith.constant dense<0.000000e+00> : vector<16x64xf32>
    %107 = tpu.matmul %104, %106, %cst_33 {dimension_numbers = #tpu.dot_dimension_numbers<[1], [0], [0], [1], [0, 0, 1, 1], [], []>} : vector<16x32xf32>, vector<32x64xf32>, vector<16x64xf32> -> vector<16x64xf32>
    %cst_34 = arith.constant 5.000000e-01 : f32
    %108 = vector.broadcast %cst_34 : f32 to vector<16x64xf32>
    %109 = arith.mulf %108, %107 : vector<16x64xf32>
    %cst_35 = arith.constant 0.707106769 : f32
    %110 = vector.broadcast %cst_35 : f32 to vector<16x64xf32>
    %111 = arith.mulf %107, %110 : vector<16x64xf32>
    %112 = math.erf %111 : vector<16x64xf32>
    %cst_36 = arith.constant 1.000000e+00 : f32
    %113 = vector.broadcast %cst_36 : f32 to vector<16x64xf32>
    %114 = arith.addf %113, %112 : vector<16x64xf32>
    %115 = arith.mulf %109, %114 : vector<16x64xf32>
    %c0_37 = arith.constant 0 : index
    %c0_38 = arith.constant 0 : index
    %c0_39 = arith.constant 0 : index
    %116 = vector.load %arg6[%c0_37, %c0_38, %c0_39] : memref<2x64x32xf32, #tpu.memory_space<vmem>>, vector<1x64x32xf32>
    %117 = vector.shape_cast %116 : vector<1x64x32xf32> to vector<64x32xf32>
    %cst_40 = arith.constant dense<0.000000e+00> : vector<16x32xf32>
    %118 = tpu.matmul %115, %117, %cst_40 {dimension_numbers = #tpu.dot_dimension_numbers<[1], [0], [0], [1], [0, 0, 1, 1], [], []>} : vector<16x64xf32>, vector<64x32xf32>, vector<16x32xf32> -> vector<16x32xf32>
    %119 = arith.addf %104, %118 : vector<16x32xf32>
    %c1_41 = arith.constant 1 : index
    %c0_42 = arith.constant 0 : index
    %c0_43 = arith.constant 0 : index
    %120 = vector.load %arg7[%c1_41, %c0_42, %c0_43] : memref<5x1x32xf32, #tpu.memory_space<vmem>>, vector<1x1x32xf32>
    %121 = vector.shape_cast %120 : vector<1x1x32xf32> to vector<1x32xf32>
    %122 = arith.mulf %119, %119 : vector<16x32xf32>
    %cst_44 = arith.constant dense<0.000000e+00> : vector<16xf32>
    %123 = vector.multi_reduction <add>, %122, %cst_44 [1] : vector<16x32xf32> to vector<16xf32>
    %124 = vector.shape_cast %123 : vector<16xf32> to vector<16x1xf32>
    %cst_45 = arith.constant 3.200000e+01 : f32
    %125 = vector.broadcast %cst_45 : f32 to vector<16x1xf32>
    %126 = arith.divf %124, %125 : vector<16x1xf32>
    %127 = math.sqrt %126 : vector<16x1xf32>
    %cst_46 = arith.constant 9.99999993E-9 : f32
    %128 = vector.broadcast %cst_46 : f32 to vector<16x1xf32>
    %129 = arith.addf %127, %128 : vector<16x1xf32>
    %130 = tpu.reciprocal %129 : vector<16x1xf32> -> vector<16x1xf32>
    %131 = vector.broadcast %130 : vector<16x1xf32> to vector<16x32xf32>
    %132 = arith.mulf %119, %131 : vector<16x32xf32>
    %133 = vector.broadcast %121 : vector<1x32xf32> to vector<16x32xf32>
    %134 = arith.mulf %132, %133 : vector<16x32xf32>
    %c1_47 = arith.constant 1 : index
    %c0_48 = arith.constant 0 : index
    %c0_49 = arith.constant 0 : index
    %135 = vector.load %arg3[%c1_47, %c0_48, %c0_49] : memref<2x32x160xf32, #tpu.memory_space<vmem>>, vector<1x32x160xf32>
    %136 = vector.shape_cast %135 : vector<1x32x160xf32> to vector<32x160xf32>
    %cst_50 = arith.constant dense<0.000000e+00> : vector<16x160xf32>
    %137 = tpu.matmul %134, %136, %cst_50 {dimension_numbers = #tpu.dot_dimension_numbers<[1], [0], [0], [1], [0, 0, 1, 1], [], []>} : vector<16x32xf32>, vector<32x160xf32>, vector<16x160xf32> -> vector<16x160xf32>
    %138 = vector.extract_strided_slice %137 {offsets = [0, 0], sizes = [16, 32], strides = [1, 1]} : vector<16x160xf32> to vector<16x32xf32>
    %139 = arith.mulf %138, %13 : vector<16x32xf32>
    %140 = vector.extract_strided_slice %137 {offsets = [0, 96], sizes = [16, 32], strides = [1, 1]} : vector<16x160xf32> to vector<16x32xf32>
    %141 = arith.mulf %140, %15 : vector<16x32xf32>
    %142 = arith.addf %139, %141 : vector<16x32xf32>
    %143 = vector.extract_strided_slice %137 {offsets = [0, 32], sizes = [16, 32], strides = [1, 1]} : vector<16x160xf32> to vector<16x32xf32>
    %144 = arith.mulf %143, %13 : vector<16x32xf32>
    %145 = vector.extract_strided_slice %137 {offsets = [0, 128], sizes = [16, 32], strides = [1, 1]} : vector<16x160xf32> to vector<16x32xf32>
    %146 = arith.mulf %145, %15 : vector<16x32xf32>
    %147 = arith.addf %144, %146 : vector<16x32xf32>
    %148 = vector.extract_strided_slice %137 {offsets = [0, 64], sizes = [16, 32], strides = [1, 1]} : vector<16x160xf32> to vector<16x32xf32>
    %149 = vector.extract_strided_slice %142 {offsets = [0, 0], sizes = [16, 8], strides = [1, 1]} : vector<16x32xf32> to vector<16x8xf32>
    %150 = vector.extract_strided_slice %142 {offsets = [0, 8], sizes = [16, 8], strides = [1, 1]} : vector<16x32xf32> to vector<16x8xf32>
    %151 = vector.extract_strided_slice %142 {offsets = [0, 16], sizes = [16, 8], strides = [1, 1]} : vector<16x32xf32> to vector<16x8xf32>
    %152 = vector.extract_strided_slice %142 {offsets = [0, 24], sizes = [16, 8], strides = [1, 1]} : vector<16x32xf32> to vector<16x8xf32>
    %153 = vector.shape_cast %149 : vector<16x8xf32> to vector<1x16x8xf32>
    %154 = vector.shape_cast %150 : vector<16x8xf32> to vector<1x16x8xf32>
    %155 = vector.shape_cast %151 : vector<16x8xf32> to vector<1x16x8xf32>
    %156 = vector.shape_cast %152 : vector<16x8xf32> to vector<1x16x8xf32>
    %157 = tpu.concatenate %153, %154, %155, %156 in 0 : vector<1x16x8xf32>, vector<1x16x8xf32>, vector<1x16x8xf32>, vector<1x16x8xf32> -> vector<4x16x8xf32>
    %158 = vector.shape_cast %157 : vector<4x16x8xf32> to vector<8x8x8xf32>
    %159 = vector.extract_strided_slice %147 {offsets = [0, 0], sizes = [16, 8], strides = [1, 1]} : vector<16x32xf32> to vector<16x8xf32>
    %160 = vector.extract_strided_slice %147 {offsets = [0, 8], sizes = [16, 8], strides = [1, 1]} : vector<16x32xf32> to vector<16x8xf32>
    %161 = vector.extract_strided_slice %147 {offsets = [0, 16], sizes = [16, 8], strides = [1, 1]} : vector<16x32xf32> to vector<16x8xf32>
    %162 = vector.extract_strided_slice %147 {offsets = [0, 24], sizes = [16, 8], strides = [1, 1]} : vector<16x32xf32> to vector<16x8xf32>
    %163 = vector.shape_cast %159 : vector<16x8xf32> to vector<1x16x8xf32>
    %164 = vector.shape_cast %160 : vector<16x8xf32> to vector<1x16x8xf32>
    %165 = vector.shape_cast %161 : vector<16x8xf32> to vector<1x16x8xf32>
    %166 = vector.shape_cast %162 : vector<16x8xf32> to vector<1x16x8xf32>
    %167 = tpu.concatenate %163, %164, %165, %166 in 0 : vector<1x16x8xf32>, vector<1x16x8xf32>, vector<1x16x8xf32>, vector<1x16x8xf32> -> vector<4x16x8xf32>
    %168 = vector.shape_cast %167 : vector<4x16x8xf32> to vector<8x8x8xf32>
    %169 = vector.extract_strided_slice %148 {offsets = [0, 0], sizes = [16, 8], strides = [1, 1]} : vector<16x32xf32> to vector<16x8xf32>
    %170 = vector.extract_strided_slice %148 {offsets = [0, 8], sizes = [16, 8], strides = [1, 1]} : vector<16x32xf32> to vector<16x8xf32>
    %171 = vector.extract_strided_slice %148 {offsets = [0, 16], sizes = [16, 8], strides = [1, 1]} : vector<16x32xf32> to vector<16x8xf32>
    %172 = vector.extract_strided_slice %148 {offsets = [0, 24], sizes = [16, 8], strides = [1, 1]} : vector<16x32xf32> to vector<16x8xf32>
    %173 = vector.shape_cast %169 : vector<16x8xf32> to vector<1x16x8xf32>
    %174 = vector.shape_cast %170 : vector<16x8xf32> to vector<1x16x8xf32>
    %175 = vector.shape_cast %171 : vector<16x8xf32> to vector<1x16x8xf32>
    %176 = vector.shape_cast %172 : vector<16x8xf32> to vector<1x16x8xf32>
    %177 = tpu.concatenate %173, %174, %175, %176 in 0 : vector<1x16x8xf32>, vector<1x16x8xf32>, vector<1x16x8xf32>, vector<1x16x8xf32> -> vector<4x16x8xf32>
    %178 = vector.shape_cast %177 : vector<4x16x8xf32> to vector<8x8x8xf32>
    "tpu.trace_start"() <{level = 10 : i32, message = "bqd,bkd->bqk"}> : () -> ()
    %cst_51 = arith.constant dense<0.000000e+00> : vector<8x8x8xf32>
    %179 = tpu.matmul %158, %168, %cst_51 {dimension_numbers = #tpu.dot_dimension_numbers<[2], [2], [1], [1], [0, 0, 0, 1, 1, 1], [0], [0]>} : vector<8x8x8xf32>, vector<8x8x8xf32>, vector<8x8x8xf32> -> vector<8x8x8xf32>
    "tpu.trace_stop"() : () -> ()
    %cst_52 = arith.constant dense<0xFF800000> : vector<8x8xf32>
    %180 = vector.multi_reduction <maximumf>, %179, %cst_52 [2] : vector<8x8x8xf32> to vector<8x8xf32>
    %181 = vector.shape_cast %180 : vector<8x8xf32> to vector<8x8x1xf32>
    %182 = vector.broadcast %181 : vector<8x8x1xf32> to vector<8x8x8xf32>
    %183 = arith.subf %179, %182 : vector<8x8x8xf32>
    %184 = math.exp %183 : vector<8x8x8xf32>
    %cst_53 = arith.constant dense<0.000000e+00> : vector<8x8xf32>
    %185 = vector.multi_reduction <add>, %184, %cst_53 [2] : vector<8x8x8xf32> to vector<8x8xf32>
    %186 = vector.shape_cast %185 : vector<8x8xf32> to vector<8x8x1xf32>
    %187 = tpu.reciprocal %186 {approx = true} : vector<8x8x1xf32> -> vector<8x8x1xf32>
    %188 = vector.broadcast %187 : vector<8x8x1xf32> to vector<8x8x8xf32>
    %189 = arith.mulf %184, %188 : vector<8x8x8xf32>
    "tpu.trace_start"() <{level = 10 : i32, message = "bqk,bkd->bqd"}> : () -> ()
    %cst_54 = arith.constant dense<0.000000e+00> : vector<8x8x8xf32>
    %190 = tpu.matmul %189, %178, %cst_54 {dimension_numbers = #tpu.dot_dimension_numbers<[2], [1], [1], [2], [0, 0, 0, 1, 1, 2], [0], [0]>} : vector<8x8x8xf32>, vector<8x8x8xf32>, vector<8x8x8xf32> -> vector<8x8x8xf32>
    "tpu.trace_stop"() : () -> ()
    %191 = vector.extract_strided_slice %190 {offsets = [0, 0, 0], sizes = [2, 8, 8], strides = [1, 1, 1]} : vector<8x8x8xf32> to vector<2x8x8xf32>
    %192 = vector.shape_cast %191 : vector<2x8x8xf32> to vector<16x8xf32>
    %193 = vector.extract_strided_slice %190 {offsets = [2, 0, 0], sizes = [2, 8, 8], strides = [1, 1, 1]} : vector<8x8x8xf32> to vector<2x8x8xf32>
    %194 = vector.shape_cast %193 : vector<2x8x8xf32> to vector<16x8xf32>
    %195 = vector.extract_strided_slice %190 {offsets = [4, 0, 0], sizes = [2, 8, 8], strides = [1, 1, 1]} : vector<8x8x8xf32> to vector<2x8x8xf32>
    %196 = vector.shape_cast %195 : vector<2x8x8xf32> to vector<16x8xf32>
    %197 = vector.extract_strided_slice %190 {offsets = [6, 0, 0], sizes = [2, 8, 8], strides = [1, 1, 1]} : vector<8x8x8xf32> to vector<2x8x8xf32>
    %198 = vector.shape_cast %197 : vector<2x8x8xf32> to vector<16x8xf32>
    %199 = tpu.concatenate %192, %194, %196, %198 in 1 : vector<16x8xf32>, vector<16x8xf32>, vector<16x8xf32>, vector<16x8xf32> -> vector<16x32xf32>
    %c1_55 = arith.constant 1 : index
    %c0_56 = arith.constant 0 : index
    %c0_57 = arith.constant 0 : index
    %200 = vector.load %arg4[%c1_55, %c0_56, %c0_57] : memref<2x32x32xf32, #tpu.memory_space<vmem>>, vector<1x32x32xf32>
    %201 = vector.shape_cast %200 : vector<1x32x32xf32> to vector<32x32xf32>
    %cst_58 = arith.constant dense<0.000000e+00> : vector<16x32xf32>
    %202 = tpu.matmul %199, %201, %cst_58 {dimension_numbers = #tpu.dot_dimension_numbers<[1], [0], [0], [1], [0, 0, 1, 1], [], []>} : vector<16x32xf32>, vector<32x32xf32>, vector<16x32xf32> -> vector<16x32xf32>
    %203 = arith.addf %134, %202 : vector<16x32xf32>
    %c2_59 = arith.constant 2 : index
    %c0_60 = arith.constant 0 : index
    %c0_61 = arith.constant 0 : index
    %204 = vector.load %arg7[%c2_59, %c0_60, %c0_61] : memref<5x1x32xf32, #tpu.memory_space<vmem>>, vector<1x1x32xf32>
    %205 = vector.shape_cast %204 : vector<1x1x32xf32> to vector<1x32xf32>
    %206 = arith.mulf %203, %203 : vector<16x32xf32>
    %cst_62 = arith.constant dense<0.000000e+00> : vector<16xf32>
    %207 = vector.multi_reduction <add>, %206, %cst_62 [1] : vector<16x32xf32> to vector<16xf32>
    %208 = vector.shape_cast %207 : vector<16xf32> to vector<16x1xf32>
    %cst_63 = arith.constant 3.200000e+01 : f32
    %209 = vector.broadcast %cst_63 : f32 to vector<16x1xf32>
    %210 = arith.divf %208, %209 : vector<16x1xf32>
    %211 = math.sqrt %210 : vector<16x1xf32>
    %cst_64 = arith.constant 9.99999993E-9 : f32
    %212 = vector.broadcast %cst_64 : f32 to vector<16x1xf32>
    %213 = arith.addf %211, %212 : vector<16x1xf32>
    %214 = tpu.reciprocal %213 : vector<16x1xf32> -> vector<16x1xf32>
    %215 = vector.broadcast %214 : vector<16x1xf32> to vector<16x32xf32>
    %216 = arith.mulf %203, %215 : vector<16x32xf32>
    %217 = vector.broadcast %205 : vector<1x32xf32> to vector<16x32xf32>
    %218 = arith.mulf %216, %217 : vector<16x32xf32>
    %c1_65 = arith.constant 1 : index
    %c0_66 = arith.constant 0 : index
    %c0_67 = arith.constant 0 : index
    %219 = vector.load %arg5[%c1_65, %c0_66, %c0_67] : memref<2x32x64xf32, #tpu.memory_space<vmem>>, vector<1x32x64xf32>
    %220 = vector.shape_cast %219 : vector<1x32x64xf32> to vector<32x64xf32>
    %cst_68 = arith.constant dense<0.000000e+00> : vector<16x64xf32>
    %221 = tpu.matmul %218, %220, %cst_68 {dimension_numbers = #tpu.dot_dimension_numbers<[1], [0], [0], [1], [0, 0, 1, 1], [], []>} : vector<16x32xf32>, vector<32x64xf32>, vector<16x64xf32> -> vector<16x64xf32>
    %cst_69 = arith.constant 5.000000e-01 : f32
    %222 = vector.broadcast %cst_69 : f32 to vector<16x64xf32>
    %223 = arith.mulf %222, %221 : vector<16x64xf32>
    %cst_70 = arith.constant 0.707106769 : f32
    %224 = vector.broadcast %cst_70 : f32 to vector<16x64xf32>
    %225 = arith.mulf %221, %224 : vector<16x64xf32>
    %226 = math.erf %225 : vector<16x64xf32>
    %cst_71 = arith.constant 1.000000e+00 : f32
    %227 = vector.broadcast %cst_71 : f32 to vector<16x64xf32>
    %228 = arith.addf %227, %226 : vector<16x64xf32>
    %229 = arith.mulf %223, %228 : vector<16x64xf32>
    %c1_72 = arith.constant 1 : index
    %c0_73 = arith.constant 0 : index
    %c0_74 = arith.constant 0 : index
    %230 = vector.load %arg6[%c1_72, %c0_73, %c0_74] : memref<2x64x32xf32, #tpu.memory_space<vmem>>, vector<1x64x32xf32>
    %231 = vector.shape_cast %230 : vector<1x64x32xf32> to vector<64x32xf32>
    %cst_75 = arith.constant dense<0.000000e+00> : vector<16x32xf32>
    %232 = tpu.matmul %229, %231, %cst_75 {dimension_numbers = #tpu.dot_dimension_numbers<[1], [0], [0], [1], [0, 0, 1, 1], [], []>} : vector<16x64xf32>, vector<64x32xf32>, vector<16x32xf32> -> vector<16x32xf32>
    %233 = arith.addf %218, %232 : vector<16x32xf32>
    %c3_76 = arith.constant 3 : index
    %c0_77 = arith.constant 0 : index
    %c0_78 = arith.constant 0 : index
    %234 = vector.load %arg7[%c3_76, %c0_77, %c0_78] : memref<5x1x32xf32, #tpu.memory_space<vmem>>, vector<1x1x32xf32>
    %235 = vector.shape_cast %234 : vector<1x1x32xf32> to vector<1x32xf32>
    %236 = arith.mulf %233, %233 : vector<16x32xf32>
    %cst_79 = arith.constant dense<0.000000e+00> : vector<16xf32>
    %237 = vector.multi_reduction <add>, %236, %cst_79 [1] : vector<16x32xf32> to vector<16xf32>
    %238 = vector.shape_cast %237 : vector<16xf32> to vector<16x1xf32>
    %cst_80 = arith.constant 3.200000e+01 : f32
    %239 = vector.broadcast %cst_80 : f32 to vector<16x1xf32>
    %240 = arith.divf %238, %239 : vector<16x1xf32>
    %241 = math.sqrt %240 : vector<16x1xf32>
    %cst_81 = arith.constant 9.99999993E-9 : f32
    %242 = vector.broadcast %cst_81 : f32 to vector<16x1xf32>
    %243 = arith.addf %241, %242 : vector<16x1xf32>
    %244 = tpu.reciprocal %243 : vector<16x1xf32> -> vector<16x1xf32>
    %245 = vector.broadcast %244 : vector<16x1xf32> to vector<16x32xf32>
    %246 = arith.mulf %233, %245 : vector<16x32xf32>
    %247 = vector.broadcast %235 : vector<1x32xf32> to vector<16x32xf32>
    %248 = arith.mulf %246, %247 : vector<16x32xf32>
    %c4 = arith.constant 4 : index
    %c0_82 = arith.constant 0 : index
    %c0_83 = arith.constant 0 : index
    %249 = vector.load %arg7[%c4, %c0_82, %c0_83] : memref<5x1x32xf32, #tpu.memory_space<vmem>>, vector<1x1x32xf32>
    %250 = vector.shape_cast %249 : vector<1x1x32xf32> to vector<1x32xf32>
    %251 = arith.mulf %248, %248 : vector<16x32xf32>
    %cst_84 = arith.constant dense<0.000000e+00> : vector<16xf32>
    %252 = vector.multi_reduction <add>, %251, %cst_84 [1] : vector<16x32xf32> to vector<16xf32>
    %253 = vector.shape_cast %252 : vector<16xf32> to vector<16x1xf32>
    %cst_85 = arith.constant 3.200000e+01 : f32
    %254 = vector.broadcast %cst_85 : f32 to vector<16x1xf32>
    %255 = arith.divf %253, %254 : vector<16x1xf32>
    %256 = math.sqrt %255 : vector<16x1xf32>
    %cst_86 = arith.constant 9.99999993E-9 : f32
    %257 = vector.broadcast %cst_86 : f32 to vector<16x1xf32>
    %258 = arith.addf %256, %257 : vector<16x1xf32>
    %259 = tpu.reciprocal %258 : vector<16x1xf32> -> vector<16x1xf32>
    %260 = vector.broadcast %259 : vector<16x1xf32> to vector<16x32xf32>
    %261 = arith.mulf %248, %260 : vector<16x32xf32>
    %262 = vector.broadcast %250 : vector<1x32xf32> to vector<16x32xf32>
    %263 = arith.mulf %261, %262 : vector<16x32xf32>
    %c0_87 = arith.constant 0 : index
    %c0_88 = arith.constant 0 : index
    %264 = vector.load %arg8[%c0_87, %c0_88] : memref<32x128xf32, #tpu.memory_space<vmem>>, vector<32x128xf32>
    %cst_89 = arith.constant dense<0.000000e+00> : vector<16x128xf32>
    %265 = tpu.matmul %263, %264, %cst_89 {dimension_numbers = #tpu.dot_dimension_numbers<[1], [0], [0], [1], [0, 0, 1, 1], [], []>} : vector<16x32xf32>, vector<32x128xf32>, vector<16x128xf32> -> vector<16x128xf32>
    %c0_90 = arith.constant 0 : index
    %c0_91 = arith.constant 0 : index
    %266 = vector.load %arg9[%c0_90, %c0_91] : memref<16x128xf32, #tpu.memory_space<vmem>>, vector<16x128xf32>
    tpu.vector_store %arg9[%c0_90, %c0_91], %265 {strides = array<i32>} : memref<16x128xf32, #tpu.memory_space<vmem>>, vector<16x128xf32>,
    return
  }
}

</mosaic_0001>

<bundles_post_ra>
// kernel: tr_for_causal_lm_forward.1
= control target key start
LH: loop header
LB: loop body
LE: loop exit
PB: predicated region body
PF: predicated region fallthrough
CT: control target
= control target key end

     0   :  { %14 = vsyncpa [#allocation3], 0  ;;  %s3431_s0 = inlined_call_operand.vmem [shape: s32[16,1], index: 0, kind: input, shape index: {}]   ;;  %s3432_s1 = inlined_call_operand.vmem [shape: f32[128,64], index: 1, kind: input, shape index: {}]   ;;  %s3433_s2 = inlined_call_operand.vmem [shape: f32[4,16,32], index: 2, kind: input, shape index: {}]   ;;  %s3434_s3 = inlined_call_operand.vmem [shape: f32[2,32,160], index: 3, kind: input, shape index: {}]   ;;  %s3435_s4 = inlined_call_operand.vmem [shape: f32[2,32,32], index: 4, kind: input, shape index: {}]   ;;  %s3436_s5 = inlined_call_operand.vmem [shape: f32[2,32,64], index: 5, kind: input, shape index: {}]   ;;  %s3437_s6 = inlined_call_operand.vmem [shape: f32[2,64,32], index: 6, kind: input, shape index: {}]   ;;  %s3438_s7 = inlined_call_operand.vmem [shape: f32[5,1,32], index: 7, kind: input, shape index: {}]   ;;  %s3439_s8 = inlined_call_operand.hbm [shape: f32[32,128], index: 8, kind: input, shape index: {}]   ;;  %s3440_s9 = inlined_call_operand.hbm [shape: f32[16,128], index: 9, kind: output, shape index: {}]  }
   0x1   :  { %15 = vsyncpa [#allocation4], 0  ;;  %s36_s11 = sshll.u32 %s3439_s8, 4  ;;  %s2668_s12 = smov [#allocation2]   ;;  %s37_s11 = int_to_ptr.hbm [resolvable:$true] %s36_s11 }
   0x2   :  { %s38_s13 = sshll.u32 %s2668_s12, 4  ;;  %s2669_s14 = smov 128   ;;  %s39_s13 = int_to_ptr.vmem [resolvable:$true] %s38_s13 }
   0x3   :  { %s2670_s15 = smov 8  }
   0x4   :  { %44 = dma.hbm_to_vmem [thread:$0]  %s37_s11, 512, %s39_s13, [#allocation3], %s2669_s14, %s2669_s14, %s2670_s15  }
   0x5   :  { %2664 = dma.done.wait [#allocation3], 512  }
   0x6   :  { %2665 = vsyncadd [#allocation3], 4294966784  ;;  %v2671_v0 = vmov 0   ;;  %v49_v1 = vld [vmem:[%s3431_s0] sm:$0xff]  ;;  %v80_v2 = vld [vmem:[%s3432_s1 + $0x78] sm:$0xff]  ;;  %s2672_s11 = smov 32   ;;  %v51_v21 = vlaneseq }
   0x7   :  { %2432 = vset.pattern.permute.xlu0 %v2671_v0  ;;  %81 = vmatpush.msra.mxu0 %v80_v2  ;;  %v79_v3 = vld [vmem:[%s3432_s1 + $0x70] sm:$0xff]  ;;  %v78_v4 = vld [vmem:[%s3432_s1 + $0x68] sm:$0xff]  ;;  %v77_v5 = vld [vmem:[%s3432_s1 + $0x60] sm:$0xff]  ;;  %v2673_v24 = vmov 1.0   ;;  %s2674_s25 = smov 96   ;;  %vm145_vm2 = vcmask 261120  }
   0x8   :  { %54 = vperm.xlu0 %2432, %v49_v1   ;;  %v50_v6 = vld [vmem:[%s3431_s0 + $0x8] sm:$0xff]  ;;  %v76_v7 = vld [vmem:[%s3432_s1 + $0x58] sm:$0xff]  ;;  %v75_v8 = vld [vmem:[%s3432_s1 + $0x50] sm:$0xff]  ;;  %v52_v22 = vand.u32 127, %v51_v21  ;;  %s2675_s21 = smov 120   ;;  %s2676_s22 = smov 112  }
   0x9   :  { %82 = vmatpush.msra.mxu0 %v79_v3  ;;  %v74_v9 = vld [vmem:[%s3432_s1 + $0x48] sm:$0xff]  ;;  %v73_v10 = vld [vmem:[%s3432_s1 + $0x40] sm:$0xff]  ;;  %v72_v11 = vld [vmem:[%s3432_s1 + $0x38] sm:$0xff]  ;;  %s2677_s23 = smov 104   ;;  %vm286_vm3 = vcmask 64512   ;;  %s2678_s24 = smov 64  }
   0xa   :  { %v71_v12 = vld [vmem:[%s3432_s1 + $0x30] sm:$0xff]  ;;  %v70_v13 = vld [vmem:[%s3432_s1 + $0x28] sm:$0xff]  ;;  %v69_v14 = vld [vmem:[%s3432_s1 + $0x20] sm:$0xff]  ;;  %s2679_s26 = smov 16   ;;  %s2680_s27 = smov 24   ;;  %vm815_vm4 = vcmask 130048  }
   0xb   :  { %83 = vmatpush.msra.mxu0 %v78_v4  ;;  %v68_v15 = vld [vmem:[%s3432_s1 + $0x18] sm:$0xff]  ;;  %v67_v16 = vld [vmem:[%s3432_s1 + $0x10] sm:$0xff]  ;;  %v66_v17 = vld [vmem:[%s3432_s1 + $0x8] sm:$0xff]  ;;  %vm818_vm5 = vcmask 195584   ;;  %s2292_s0 = sshll.u32 %s3440_s9, 4  ;;  %s2293_s0 = int_to_ptr.hbm [resolvable:$true] %s2292_s0 }
   0xc   :  { %v65_v18 = vld [vmem:[%s3432_s1] sm:$0xff]  ;;  %v2309_v19 = vld [vmem:[%s3433_s2 + $0x10] sm:$0xff]  ;;  %v2310_v20 = vld [vmem:[%s3433_s2 + $0x18] sm:$0xff] }
   0xd   :  { %84 = vmatpush.msra.mxu0 %v77_v5  ;;  %119 = vrot.lane.b32.xlu1 %v2309_v19, %s2672_s11  ;;  %v143_v26 = vld [vmem:[%s3434_s3 + $0x30] sm:$0xff]  ;;  %v144_v27 = vld [vmem:[%s3434_s3 + $0x38] sm:$0xff]  ;;  %v141_v28 = vld [vmem:[%s3434_s3 + $0x20] sm:$0xff] }
   0xe   :  { %164 = vmatpush.msra.mxu1 %v143_v26  ;;  %187 = vmatpush.msra.mxu2 %v144_v27  ;;  %v142_v29 = vld [vmem:[%s3434_s3 + $0x28] sm:$0xff]  ;;  %v139_v30 = vld [vmem:[%s3434_s3 + $0x10] sm:$0xff]  ;;  %v140_v31 = vld [vmem:[%s3434_s3 + $0x18] sm:$0xff] }
   0xf   :  { %85 = vmatpush.msra.mxu0 %v76_v7  ;;  %v137_v38 = vld [vmem:[%s3434_s3] sm:$0xff]  ;;  %v138_v39 = vld [vmem:[%s3434_s3 + $0x8] sm:$0xff]  ;;  %v2313_v41 = vld [vmem:[%s3433_s2 + $0x30] sm:$0xff] }
  0x10   :  { %57 = vperm.xlu0 %2432, %v50_v6   ;;  %165 = vmatpush.msra.mxu1 %v141_v28  ;;  %v2311_v40 = vld [vmem:[%s3433_s2 + $0x20] sm:$0xff]  ;;  %v2312_v42 = vld [vmem:[%s3433_s2 + $0x28] sm:$0xff]  ;;  %v2314_v43 = vld [vmem:[%s3433_s2 + $0x38] sm:$0xff] }
  0x11   :  { %86 = vmatpush.msra.mxu0 %v75_v8  ;;  %188 = vmatpush.msra.mxu2 %v142_v29  ;;  %v104_v44 = vld [vmem:[%s3433_s2] sm:$0xff]  ;;  %v105_v48 = vld [vmem:[%s3433_s2 + $0x8] sm:$0xff] }
  0x12   :  { %166 = vmatpush.msra.mxu1 %v139_v30 }
  0x13   :  { %87 = vmatpush.msra.mxu0 %v74_v9  ;;  %189 = vmatpush.msra.mxu2 %v140_v31 }
  0x14   :  { %167 = vmatpush.msra.mxu1 %v137_v38 }
  0x15   :  { %88 = vmatpush.msra.mxu0 %v73_v10  ;;  %121 = vrot.lane.b32.xlu1 %v2310_v20, %s2672_s11 }
  0x16   :  { %190 = vmatpush.msra.mxu2 %v138_v39 }
  0x17   :  { %89 = vmatpush.msra.mxu0 %v72_v11 }
  0x18   :  { %222 = vrot.lane.b32.xlu0 %v2311_v40, %s2672_s11 }
  0x19   :  { %90 = vmatpush.msra.mxu0 %v71_v12 }
  0x1b   :  { %91 = vmatpush.msra.mxu0 %v70_v13 }
  0x1d   :  { %92 = vmatpush.msra.mxu0 %v69_v14 }
  0x1f   :  { %93 = vmatpush.msra.mxu0 %v68_v15 }
  0x20   :  { %224 = vrot.lane.b32.xlu0 %v2312_v42, %s2672_s11 }
  0x21   :  { %94 = vmatpush.msra.mxu0 %v67_v16 }
  0x23   :  { %95 = vmatpush.msra.mxu0 %v66_v17 }
  0x25   :  { %96 = vmatpush.msra.mxu0 %v65_v18 }
  0x7a   :  { %v55_v23 = vpop.permute.xlu0 %54 }
  0x7b   :  { %vm59_vm0 = vcmp.eq.s32.totalorder %v52_v22, %v55_v23 }
  0x7c   :  { %2307 = vmatmul.msk.f32.vlgmr.msra.gmra.mxu0 %vm59_vm0, %v2673_v24 }
  0x7f   :  { %v120_v32 = vpop.permute.xlu1 %119 }
  0x82   :  { %v58_v25 = vpop.permute.xlu0 %57 }
  0x83   :  { %vm60_vm1 = vcmp.eq.s32.totalorder %v52_v22, %v58_v25 }
  0x84   :  { %2308 = vmatmul.msk.f32.gmra.mxu0 %vm60_vm1, %v2673_v24 }
  0x87   :  { %v122_v35 = vpop.permute.xlu1 %121 }
  0x8a   :  { %v2877_v62 = vpop.permute.xlu0 %222 }
  0x92   :  { %v2882_v2 = vpop.permute.xlu0 %224 }
  0xf9   :  { %v98_v33 = vpop.f32.mrf.mxu0 }
  0xfa   :  { %v125_v34 = vmul.f32 %v120_v32, %v98_v33  ;;  %v115_v45 = vmul.f32 %v104_v44, %v98_v33 }
  0xfc   :  { %129 = vrot.lane.b32.xlu2 %v125_v34, %s2674_s25 }
 0x101   :  { %v101_v36 = vpop.f32.mrf.mxu0 }
 0x102   :  { %v126_v37 = vmul.f32 %v122_v35, %v101_v36  ;;  %v116_v49 = vmul.f32 %v105_v48, %v101_v36 }
 0x104   :  { %131 = vrot.lane.b32.xlu2 %v126_v37, %s2674_s25 }
 0x10c   :  { %202 = vrot.lane.b32.xlu2 %v2313_v41, %s2674_s25 }
 0x114   :  { %204 = vrot.lane.b32.xlu2 %v2314_v43, %s2674_s25 }
 0x156   :  { %v130_v46 = vpop.permute.xlu2 %129 }
 0x157   :  { %v2846_v47 = vadd.f32 %v130_v46, %v115_v45 }
 0x159   :  { %2315 = vmatmul.msk.f32.vlgmr.msra.gmra.mxu1 %vm145_vm2, %v2846_v47  ;;  %2317 = vmatmul.msk.f32.vlgmr.msra.gmra.mxu2 %vm145_vm2, %v2846_v47 }
 0x15e   :  { %v132_v50 = vpop.permute.xlu2 %131 }
 0x15f   :  { %v2855_v51 = vadd.f32 %v132_v50, %v116_v49 }
 0x161   :  { %2316 = vmatmul.msk.f32.gmra.mxu1 %vm145_vm2, %v2855_v51  ;;  %2318 = vmatmul.msk.f32.gmra.mxu2 %vm145_vm2, %v2855_v51 }
 0x166   :  { %v2865_v57 = vpop.permute.xlu2 %202 }
 0x16e   :  { %v2870_v59 = vpop.permute.xlu2 %204 }
 0x1d6   :  { %v2863_v56 = vpop.f32.mrf.mxu1 }
 0x1d7   :  { %v208_v58 = vmul.f32 %v2865_v57, %v2863_v56  ;;  %v228_v63 = vmul.f32 %v2877_v62, %v2863_v56  ;;  %v198_v7 = vmul.f32 %v2311_v40, %v2863_v56 }
 0x1dc   :  { %v192_v52 = vpop.f32.mrf.mxu2 }
 0x1dd   :  { %v230_v53 = vmul.f32 %v2313_v41, %v192_v52 }
 0x1de   :  { %v2872_v60 = vpop.f32.mrf.mxu1 }
 0x1df   :  { %234 = vrot.lane.b32.xlu1 %v230_v53, %s2672_s11  ;;  %v209_v61 = vmul.f32 %v2870_v59, %v2872_v60  ;;  %v229_v3 = vmul.f32 %v2882_v2, %v2872_v60  ;;  %v199_v10 = vmul.f32 %v2312_v42, %v2872_v60  ;;  %v2438_v17 = vpack.i.bf16 %v2872_v60, %v2863_v56 }
 0x1e4   :  { %v195_v54 = vpop.f32.mrf.mxu2 }
 0x1e5   :  { %v231_v55 = vmul.f32 %v2314_v43, %v195_v54 }
 0x1e7   :  { %236 = vrot.lane.b32.xlu1 %v231_v55, %s2672_s11 }
 0x1ef   :  { %212 = vrot.lane.b32.xlu1 %v208_v58, %s2672_s11 }
 0x1f7   :  { %214 = vrot.lane.b32.xlu1 %v209_v61, %s2672_s11 }
 0x251   :  { %v235_v0 = vpop.permute.xlu1 %234 }
 0x252   :  { %v240_v1 = vadd.f32 %v235_v0, %v228_v63 }
 0x254   :  { %258 = vrot.lane.b32.xlu0 %v240_v1, %s2675_s21 }
 0x259   :  { %v237_v4 = vpop.permute.xlu1 %236 }
 0x25a   :  { %v241_v5 = vadd.f32 %v237_v4, %v229_v3 }
 0x25c   :  { %262 = vrot.lane.b32.xlu0 %v240_v1, %s2676_s22  ;;  %264 = vrot.lane.b32.xlu1 %v241_v5, %s2676_s22 }
 0x25d   :  { %260 = vrot.lane.b32.xlu2 %v241_v5, %s2675_s21 }
 0x261   :  { %v213_v6 = vpop.permute.xlu1 %212 }
 0x262   :  { %v218_v8 = vadd.f32 %v213_v6, %v198_v7 }
 0x264   :  { %268 = vrot.lane.b32.xlu0 %v241_v5, %s2677_s23 }
 0x265   :  { %266 = vrot.lane.b32.xlu2 %v240_v1, %s2677_s23 }
 0x269   :  { %v215_v9 = vpop.permute.xlu1 %214 }
 0x26a   :  { %v219_v11 = vadd.f32 %v215_v9, %v199_v10 }
 0x26c   :  { %311 = vrot.lane.b32.xlu0 %v241_v5, %s2674_s25 }
 0x26d   :  { %284 = vrot.lane.b32.xlu2 %v240_v1, %s2674_s25 }
 0x274   :  { %248 = vrot.lane.b32.xlu0 %v218_v8, %s2676_s22 }
 0x275   :  { %244 = vrot.lane.b32.xlu2 %v218_v8, %s2675_s21 }
 0x27d   :  { %246 = vrot.lane.b32.xlu2 %v219_v11, %s2675_s21 }
 0x2b7   :  { %v261_v12 = vpop.permute.xlu2 %260 }
 0x2b8   :  { %363 = vrot.lane.b32.xlu0 %v261_v12, %s2674_s25 }
 0x2bf   :  { %v267_v13 = vpop.permute.xlu2 %266 }
 0x2c0   :  { %252 = vrot.lane.b32.xlu0 %v218_v8, %s2677_s23 }
 0x2c6   :  { %v259_v14 = vpop.permute.xlu0 %258 }
 0x2c7   :  { %v285_v15 = vpop.permute.xlu2 %284  ;;  %337 = vrot.lane.b32.xlu1 %v259_v14, %s2674_s25 }
 0x2c8   :  { %250 = vrot.lane.b32.xlu0 %v219_v11, %s2676_s22  ;;  %2319 = vmatpush.xpose.msk.msra.mxu3 %vm286_vm3, %v285_v15 }
 0x2cb   :  { %2320 = vmatmul.msk.f32.vlgmr.msra.gmra.mxu3 %vm286_vm3, %v218_v8 }
 0x2ce   :  { %v263_v16 = vpop.permute.xlu0 %262  ;;  %v265_v19 = vpop.permute.xlu1 %264 }
 0x2cf   :  { %389 = vrot.lane.b32.xlu1 %v263_v16, %s2674_s25  ;;  %v245_v21 = vpop.permute.xlu2 %244 }
 0x2d0   :  { %2439 = vrot.lane.b32.xlu0 %v2438_v17, %s2677_s23 }
 0x2d6   :  { %v269_v18 = vpop.permute.xlu0 %268 }
 0x2d7   :  { %441 = vrot.lane.b32.xlu1 %v267_v13, %s2674_s25  ;;  %467 = vrot.lane.b32.xlu2 %v269_v18, %s2674_s25  ;;  %v247_v22 = vpop.permute.xlu2 %246 }
 0x2de   :  { %v312_v20 = vpop.permute.xlu0 %311 }
 0x2df   :  { %254 = vrot.lane.b32.xlu1 %v219_v11, %s2677_s23  ;;  %415 = vrot.lane.b32.xlu2 %v265_v19, %s2674_s25 }
 0x2e0   :  { %2321 = vmatpush.xpose.msk.msrb.mxu3 %vm286_vm3, %v312_v20 }
 0x2e3   :  { %2322 = vmatmul.msk.f32.vlgmr.msrb.gmra.mxu3 %vm286_vm3, %v219_v11 }
 0x2e6   :  { %v249_v23 = vpop.permute.xlu0 %248 }
 0x2e7   :  { %2444 = vrot.lane.b32.xlu1 %v2438_v17, %s2676_s22  ;;  %2434 = vrot.lane.b32.xlu2 %v2438_v17, %s2675_s21 }
 0x32a   :  { %v364_v25 = vpop.permute.xlu0 %363 }
 0x331   :  { %v468_v24 = vpop.permute.xlu2 %467 }
 0x332   :  { %v253_v29 = vpop.permute.xlu0 %252 }
 0x339   :  { %v338_v26 = vpop.permute.xlu1 %337  ;;  %v416_v27 = vpop.permute.xlu2 %415 }
 0x33a   :  { %2323 = vmatpush.xpose.msk.msra.mxu3 %vm286_vm3, %v338_v26  ;;  %v251_v31 = vpop.permute.xlu0 %250 }
 0x33d   :  { %2324 = vmatmul.msk.f32.vlgmr.msra.gmra.mxu3 %vm286_vm3, %v245_v21 }
 0x33e   :  { %2325 = vmatpush.xpose.msk.msrb.mxu3 %vm286_vm3, %v364_v25 }
 0x341   :  { %v390_v28 = vpop.permute.xlu1 %389  ;;  %v2943_v4 = vpop.permute.xlu2 %2434 }
 0x342   :  { %2329 = vmatpush.xpose.msk.msra.mxu3 %vm286_vm3, %v416_v27  ;;  %2327 = vmatpush.xpose.msk.msrb.mxu2 %vm286_vm3, %v390_v28  ;;  %v2436_v5 = vunpack.i.l.bf16 %v2943_v4  ;;  %v2948_v7 = vpop.permute.xlu0 %2439 }
 0x344   :  { %v2448_v6 = vpack.i.bf16 %v2436_v5, %v2863_v56 }
 0x345   :  { %2326 = vmatmul.msk.f32.vlgmr.msrb.gmra.mxu3 %vm286_vm3, %v247_v22  ;;  %2328 = vmatmul.msk.f32.vlgmr.msrb.gmra.mxu2 %vm286_vm3, %v249_v23 }
 0x346   :  { %2333 = vmatpush.xpose.msk.msra.mxu2 %vm286_vm3, %v468_v24 }
 0x349   :  { %v442_v30 = vpop.permute.xlu1 %441 }
 0x34a   :  { %2331 = vmatpush.xpose.msk.msrb.mxu1 %vm286_vm3, %v442_v30 }
 0x34d   :  { %2330 = vmatmul.msk.f32.vlgmr.msra.gmra.mxu3 %vm286_vm3, %v251_v31  ;;  %2332 = vmatmul.msk.f32.vlgmr.msrb.gmra.mxu1 %vm286_vm3, %v253_v29 }
 0x34e   :  { %v308_v32 = vpop.f32.mrf.mxu3 }
 0x34f   :  { %v493_v33 = vsel %vm286_vm3, %v308_v32, -inf }
 0x350   :  { %494 = vmax.xlane.f32.xlu1 %v493_v33 }
 0x351   :  { %v255_v34 = vpop.permute.xlu1 %254 }
 0x352   :  { %2334 = vmatmul.msk.f32.vlgmr.msra.gmra.mxu2 %vm286_vm3, %v255_v34 }
 0x359   :  { %v2930_v38 = vpop.permute.xlu1 %2444 }
 0x366   :  { %v334_v35 = vpop.f32.mrf.mxu3 }
 0x367   :  { %v496_v36 = vsel %vm286_vm3, %v334_v35, -inf }
 0x368   :  { %497 = vmax.xlane.f32.xlu1 %v496_v36 }
 0x3c0   :  { %v360_v37 = vpop.f32.mrf.mxu3 }
 0x3c1   :  { %v499_v50 = vsel %vm286_vm3, %v360_v37, -inf }
 0x3c3   :  { %v495_v41 = vpop.xlane.xlu1 %494 }
 0x3c4   :  { %v517_v44 = vsub.f32 %v308_v32, %v495_v41 }
 0x3c6   :  { %v525_v48 = vmul.f32 1.442695, %v517_v44  ;;  %v2446_v44 = vunpack.i.l.bf16 %v2930_v38 }
 0x3c8   :  { %v386_v39 = vpop.f32.mrf.mxu3  ;;  %v412_v45 = vpop.f32.mrf.mxu2  ;;  %2498 = vpow2.f32 %v525_v48  ;;  %v2458_v48 = vpack.i.bf16 %v2446_v44, %v2872_v60 }
 0x3c9   :  { %v502_v40 = vsel %vm286_vm3, %v386_v39, -inf  ;;  %v505_v58 = vsel %vm286_vm3, %v412_v45, -inf }
 0x3ca   :  { %503 = vmax.xlane.f32.xlu0 %v502_v40  ;;  %v464_v42 = vpop.f32.mrf.mxu1 }
 0x3cb   :  { %v511_v43 = vsel %vm286_vm3, %v464_v42, -inf }
 0x3cc   :  { %512 = vmax.xlane.f32.xlu2 %v511_v43 }
 0x3ce   :  { %v2499_v54 = vpop.eup %2498 }
 0x3cf   :  { %v541_v0 = vsel %vm286_vm3, %v2499_v54, 0.0 }
 0x3d0   :  { %v438_v46 = vpop.f32.mrf.mxu3 }
 0x3d1   :  { %v508_v49 = vsel %vm286_vm3, %v438_v46, -inf }
 0x3d2   :  { %509 = vmax.xlane.f32.xlu1 %v508_v49 }
 0x3d4   :  { %500 = vmax.xlane.f32.xlu2 %v499_v50  ;;  %v2447_v50 = vunpack.i.h.bf16 %v2930_v38 }
 0x3d5   :  { %v490_v52 = vpop.f32.mrf.mxu2 }
 0x3d6   :  { %v514_v53 = vsel %vm286_vm3, %v490_v52, -inf }
 0x3d7   :  { %515 = vmax.xlane.f32.xlu0 %v514_v53 }
 0x3db   :  { %v498_v55 = vpop.xlane.xlu1 %497 }
 0x3dc   :  { %v518_v61 = vsub.f32 %v334_v35, %v498_v55  ;;  %506 = vmax.xlane.f32.xlu2 %v505_v58 }
 0x3de   :  { %v527_v63 = vmul.f32 1.442695, %v518_v61 }
 0x3df   :  { %542 = vadd.xlane.f32.xlu0 %v541_v0 }
 0x3e0   :  { %2500 = vpow2.f32 %v527_v63 }
 0x3e6   :  { %v2939_v1 = vpop.eup %2500 }
 0x3e7   :  { %v544_v3 = vsel %vm286_vm3, %v2939_v1, 0.0 }
 0x3e8   :  { %545 = vadd.xlane.f32.xlu1 %v544_v3 }
 0x3f4   :  { %2449 = vrot.lane.b32.xlu2 %v2448_v6, %s2678_s24 }
 0x43d   :  { %v504_v8 = vpop.xlane.xlu0 %503 }
 0x43e   :  { %v520_v9 = vsub.f32 %v386_v39, %v504_v8 }
 0x43f   :  { %v513_v10 = vpop.xlane.xlu2 %512 }
 0x440   :  { %v531_v11 = vmul.f32 1.442695, %v520_v9  ;;  %v523_v12 = vsub.f32 %v464_v42, %v513_v10 }
 0x442   :  { %2502 = vpow2.f32 %v531_v11  ;;  %v537_v13 = vmul.f32 1.442695, %v523_v12 }
 0x444   :  { %2504 = vpow2.f32 %v537_v13 }
 0x445   :  { %v510_v18 = vpop.xlane.xlu1 %509 }
 0x446   :  { %v522_v23 = vsub.f32 %v438_v46, %v510_v18  ;;  %v2441_v46 = vunpack.i.l.bf16 %v2948_v7 }
 0x447   :  { %v501_v14 = vpop.xlane.xlu2 %500 }
 0x448   :  { %v2950_v15 = vpop.eup %2502  ;;  %v519_v16 = vsub.f32 %v360_v37, %v501_v14  ;;  %v535_v27 = vmul.f32 1.442695, %v522_v23 }
 0x449   :  { %v550_v56 = vsel %vm286_vm3, %v2950_v15, 0.0 }
 0x44a   :  { %v2954_v17 = vpop.eup %2504  ;;  %v529_v19 = vmul.f32 1.442695, %v519_v16  ;;  %551 = vadd.xlane.f32.xlu1 %v550_v56  ;;  %v516_v20 = vpop.xlane.xlu0 %515 }
 0x44b   :  { %v524_v21 = vsub.f32 %v490_v52, %v516_v20  ;;  %v559_v22 = vsel %vm286_vm3, %v2954_v17, 0.0  ;;  %v2442_v52 = vunpack.i.h.bf16 %v2948_v7 }
 0x44c   :  { %2506 = vpow2.f32 %v529_v19  ;;  %560 = vadd.xlane.f32.xlu0 %v559_v22 }
 0x44d   :  { %v539_v24 = vmul.f32 1.442695, %v524_v21 }
 0x44f   :  { %2508 = vpow2.f32 %v539_v24  ;;  %v507_v25 = vpop.xlane.xlu2 %506 }
 0x450   :  { %v521_v26 = vsub.f32 %v412_v45, %v507_v25  ;;  %v2437_v45 = vunpack.i.h.bf16 %v2943_v4 }
 0x452   :  { %v2507_v28 = vpop.eup %2506  ;;  %v533_v29 = vmul.f32 1.442695, %v521_v26  ;;  %v543_v30 = vpop.xlane.xlu0 %542  ;;  %v2453_v49 = vpack.i.bf16 %v2441_v46, %v2437_v45 }
 0x453   :  { %2510 = vrcp.f32 %v543_v30  ;;  %v547_v31 = vsel %vm286_vm3, %v2507_v28, 0.0  ;;  %v823_v30 = vld [vmem:[%s3435_s4 + $0x10] sm:$0xff] }
 0x454   :  { %2512 = vpow2.f32 %v533_v29  ;;  %548 = vadd.xlane.f32.xlu2 %v547_v31  ;;  %v824_v29 = vld [vmem:[%s3435_s4 + $0x18] sm:$0xff]  ;;  %v822_v31 = vld [vmem:[%s3435_s4 + $0x8] sm:$0xff] }
 0x455   :  { %v2959_v32 = vpop.eup %2508  ;;  %2514 = vpow2.f32 %v535_v27 }
 0x456   :  { %v562_v33 = vsel %vm286_vm3, %v2959_v32, 0.0 }
 0x457   :  { %v2450_v34 = vpop.permute.xlu2 %2449  ;;  %563 = vadd.xlane.f32.xlu1 %v562_v33 }
 0x458   :  { %v2452_v35 = vunpack.i.h.bf16 %v2450_v34  ;;  %v2451_v36 = vunpack.i.l.bf16 %v2450_v34 }
 0x459   :  { %v2511_v37 = vpop.eup %2510 }
 0x45a   :  { %v2513_v39 = vpop.eup %2512  ;;  %v573_v40 = vmul.f32 %v2511_v37, %v2499_v54  ;;  %602 = vmatpush.msrb.mxu3 %v2451_v36  ;;  %654 = vmatpush.msrb.mxu2 %v2452_v35 }
 0x45b   :  { %v2515_v41 = vpop.eup %2514  ;;  %v553_v42 = vsel %vm286_vm3, %v2513_v39, 0.0  ;;  %v546_v53 = vpop.xlane.xlu1 %545 }
 0x45c   :  { %554 = vadd.xlane.f32.xlu0 %v553_v42  ;;  %2335 = vmatmul.msk.f32.vlgmr.msrb.gmra.mxu3 %vm286_vm3, %v573_v40  ;;  %v556_v43 = vsel %vm286_vm3, %v2515_v41, 0.0  ;;  %2516 = vrcp.f32 %v546_v53 }
 0x45f   :  { %557 = vadd.xlane.f32.xlu1 %v556_v43 }
 0x462   :  { %v2517_v61 = vpop.eup %2516 }
 0x463   :  { %v574_v6 = vmul.f32 %v2517_v61, %v2939_v1 }
 0x46c   :  { %2459 = vrot.lane.b32.xlu2 %v2458_v48, %s2678_s24 }
 0x470   :  { %2454 = vrot.lane.b32.xlu0 %v2453_v49, %s2678_s24 }
 0x474   :  { %711 = vrot.lane.b32.xlu2 %v2447_v50, %s2678_s24 }
 0x478   :  { %763 = vrot.lane.b32.xlu1 %v2442_v52, %s2678_s24 }
 0x4bd   :  { %v552_v54 = vpop.xlane.xlu1 %551 }
 0x4bf   :  { %v561_v55 = vpop.xlane.xlu0 %560 }
 0x4c7   :  { %v549_v58 = vpop.xlane.xlu2 %548 }
 0x4c8   :  { %2518 = vrcp.f32 %v549_v58  ;;  %v2681_v58 = vmov 32.0  }
 0x4ca   :  { %v564_v60 = vpop.xlane.xlu1 %563 }
 0x4ce   :  { %v2519_v63 = vpop.eup %2518 }
 0x4cf   :  { %v575_v0 = vmul.f32 %v2519_v63, %v2507_v28  ;;  %v2460_v3 = vpop.permute.xlu2 %2459  ;;  %v555_v4 = vpop.xlane.xlu0 %554 }
 0x4d0   :  { %v2461_v5 = vunpack.i.l.bf16 %v2460_v3  ;;  %2520 = vrcp.f32 %v555_v4  ;;  %v2462_v38 = vunpack.i.h.bf16 %v2460_v3  ;;  %v938_v3 = vld [vmem:[%s3436_s5 + $0x18] sm:$0xff] }
 0x4d1   :  { %2337 = vmatmul.msk.f32.vlgmr.msrb.gmra.mxu2 %vm286_vm3, %v575_v0 }
 0x4d2   :  { %628 = vmatpush.msra.mxu1 %v2461_v5  ;;  %706 = vmatpush.msrb.mxu0 %v2462_v38  ;;  %v558_v7 = vpop.xlane.xlu1 %557  ;;  %v936_v5 = vld [vmem:[%s3436_s5 + $0x8] sm:$0xff] }
 0x4d3   :  { %2522 = vrcp.f32 %v558_v7  ;;  %2336 = vmatmul.msk.f32.vlgmr.msra.gmra.mxu1 %vm286_vm3, %v574_v6  ;;  %v935_v7 = vld [vmem:[%s3436_s5] sm:$0xff] }
 0x4d4   :  { %2524 = vrcp.f32 %v552_v54  ;;  %843 = vmatpush.msra.mxu0 %v824_v29 }
 0x4d5   :  { %2526 = vrcp.f32 %v561_v55 }
 0x4d6   :  { %v2521_v8 = vpop.eup %2520  ;;  %2528 = vrcp.f32 %v564_v60  ;;  %844 = vmatpush.msra.mxu0 %v823_v30 }
 0x4d7   :  { %v712_v9 = vpop.permute.xlu2 %711  ;;  %v577_v10 = vmul.f32 %v2521_v8, %v2513_v39  ;;  %2530 = vrcp.f32 %v2681_v58 }
 0x4d8   :  { %732 = vmatpush.msrb.mxu1 %v712_v9  ;;  %845 = vmatpush.msra.mxu0 %v822_v31 }
 0x4d9   :  { %v2523_v11 = vpop.eup %2522  ;;  %2339 = vmatmul.msk.f32.vlgmr.msrb.gmra.mxu0 %vm286_vm3, %v577_v10 }
 0x4da   :  { %v578_v12 = vmul.f32 %v2523_v11, %v2515_v41  ;;  %v2525_v1 = vpop.eup %2524  ;;  %957 = vmatpush.msra.mxu1 %v938_v3 }
 0x4db   :  { %v2527_v13 = vpop.eup %2526  ;;  %v576_v18 = vmul.f32 %v2525_v1, %v2950_v15 }
 0x4dc   :  { %2340 = vmatmul.msk.f32.vlgmr.msrb.gmra.mxu1 %vm286_vm3, %v578_v12  ;;  %v579_v19 = vmul.f32 %v2527_v13, %v2954_v17  ;;  %v2529_v20 = vpop.eup %2528 }
 0x4dd   :  { %v580_v22 = vmul.f32 %v2529_v20, %v2959_v32  ;;  %v821_v32 = vld [vmem:[%s3435_s4] sm:$0xff] }
 0x4de   :  { %846 = vmatpush.msra.mxu0 %v821_v32 }
 0x4df   :  { %v604_v15 = vpop.f32.mrf.mxu3 }
 0x4e2   :  { %v2455_v14 = vpop.permute.xlu0 %2454 }
 0x4e3   :  { %v2457_v16 = vunpack.i.h.bf16 %v2455_v14  ;;  %v2456_v56 = vunpack.i.l.bf16 %v2455_v14 }
 0x4e5   :  { %680 = vmatpush.msra.mxu3 %v2456_v56  ;;  %758 = vmatpush.msra.mxu2 %v2457_v16 }
 0x4e6   :  { %2338 = vmatmul.msk.f32.vlgmr.msra.gmra.mxu3 %vm286_vm3, %v576_v18  ;;  %2341 = vmatmul.msk.f32.vlgmr.msra.gmra.mxu2 %vm286_vm3, %v579_v19 }
 0x4ea   :  { %v764_v21 = vpop.permute.xlu1 %763 }
 0x4eb   :  { %784 = vmatpush.msrb.mxu3 %v764_v21 }
 0x4ee   :  { %2342 = vmatmul.msk.f32.vlgmr.msrb.gmra.mxu3 %vm286_vm3, %v580_v22 }
 0x550   :  { %v630_v17 = vpop.f32.mrf.mxu1 }
 0x554   :  { %v656_v23 = vpop.f32.mrf.mxu2 }
 0x555   :  { %791 = vrot.lane.b32.xlu0 %v656_v23, %s2670_s15 }
 0x556   :  { %v708_v24 = vpop.f32.mrf.mxu0 }
 0x557   :  { %799 = vrot.lane.b32.xlu2 %v708_v24, %s2679_s26 }
 0x559   :  { %v734_v27 = vpop.f32.mrf.mxu1 }
 0x569   :  { %v682_v25 = vpop.f32.mrf.mxu3  ;;  %v760_v26 = vpop.f32.mrf.mxu2 }
 0x56a   :  { %807 = vrot.lane.b32.xlu0 %v760_v26, %s2680_s27  ;;  %793 = vrot.lane.b32.xlu2 %v682_v25, %s2670_s15 }
 0x571   :  { %v786_v28 = vpop.f32.mrf.mxu3 }
 0x572   :  { %801 = vrot.lane.b32.xlu0 %v734_v27, %s2679_s26  ;;  %809 = vrot.lane.b32.xlu1 %v786_v28, %s2680_s27 }
 0x5b1   :  { %v800_v34 = vpop.permute.xlu2 %799 }
 0x5c4   :  { %v794_v40 = vpop.permute.xlu2 %793 }
 0x5c5   :  { %v814_v41 = vsel %vm286_vm3, %v630_v17, %v794_v40 }
 0x5c7   :  { %v792_v33 = vpop.permute.xlu0 %791 }
 0x5c8   :  { %v813_v35 = vsel %vm286_vm3, %v604_v15, %v792_v33 }
 0x5c9   :  { %v816_v36 = vsel %vm815_vm4, %v813_v35, %v800_v34 }
 0x5dc   :  { %v808_v37 = vpop.permute.xlu0 %807 }
 0x5dd   :  { %v819_v39 = vsel %vm818_vm5, %v816_v36, %v808_v37 }
 0x5de   :  { %2343 = vmatmul.msk.f32.vlgmr.msra.gmra.mxu0 %vm145_vm2, %v819_v39 }
 0x5e4   :  { %v802_v42 = vpop.permute.xlu0 %801  ;;  %v810_v43 = vpop.permute.xlu1 %809 }
 0x5e5   :  { %v817_v44 = vsel %vm815_vm4, %v814_v41, %v802_v42  ;;  %v2493_v41 = vld [vmem:[%s3438_s7] ss:$0 sm:$0xff] }
 0x5e6   :  { %v820_v45 = vsel %vm818_vm5, %v817_v44, %v810_v43 }
 0x5e7   :  { %2344 = vmatmul.msk.f32.gmra.mxu0 %vm145_vm2, %v820_v45 }
 0x65b   :  { %v848_v46 = vpop.f32.mrf.mxu0 }
 0x65c   :  { %v3014_v48 = vadd.f32 %v848_v46, %v2846_v47  ;;  %v2531_v47 = vpop.eup %2530 }
 0x65d   :  { %v866_v60 = vmul.f32 32.0, %v2531_v47  ;;  %vm870_vm6 = vweird.f32 %v2531_v47 }
 0x65e   :  { %v857_v49 = vmul.f32 %v3014_v48, %v3014_v48 }
 0x65f   :  { %v867_v61 = vsub.f32 1.0, %v866_v60 }
 0x660   :  { %v859_v50 = vsel %vm145_vm2, %v857_v49, 0.0 }
 0x661   :  { %860 = vadd.xlane.f32.xlu2 %v859_v50  ;;  %v868_v63 = vmul.f32 %v2531_v47, %v867_v61 }
 0x663   :  { %v869_v0 = vadd.f32 %v2531_v47, %v868_v63 }
 0x664   :  { %v851_v52 = vpop.f32.mrf.mxu0 }
 0x665   :  { %v3020_v53 = vadd.f32 %v851_v52, %v2855_v51  ;;  %v937_v51 = vld [vmem:[%s3436_s5 + $0x10] sm:$0xff]  ;;  %v3031_v4 = vsel %vm870_vm6, %v2531_v47, %v869_v0 }
 0x666   :  { %958 = vmatpush.msra.mxu1 %v937_v51  ;;  %v1063_v51 = vld [vmem:[%s3437_s6 + $0x38] sm:$0xff] }
 0x667   :  { %v858_v54 = vmul.f32 %v3020_v53, %v3020_v53  ;;  %1079 = vmatpush.msrb.mxu2 %v1063_v51 }
 0x668   :  { %959 = vmatpush.msra.mxu1 %v936_v5 }
 0x669   :  { %v862_v55 = vsel %vm145_vm2, %v858_v54, 0.0 }
 0x66a   :  { %863 = vadd.xlane.f32.xlu0 %v862_v55  ;;  %960 = vmatpush.msra.mxu1 %v935_v7 }
 0x6d4   :  { %v861_v38 = vpop.xlane.xlu2 %860 }
 0x6d5   :  { %v872_v6 = vmul.f32 %v3031_v4, %v861_v38  ;;  %v1062_v38 = vld [vmem:[%s3437_s6 + $0x30] sm:$0xff] }
 0x6d6   :  { %1080 = vmatpush.msrb.mxu2 %v1062_v38 }
 0x6d7   :  { %2532 = vrsqrt.f32 %v872_v6  ;;  %vm881_vm7 = vcmp.eq.f32.partialorder %v872_v6, inf  ;;  %v884_v19 = vand.u32 2147483648, %v872_v6  ;;  %vm883_vm8 = vcmp.eq.f32.partialorder %v872_v6, 0.0 }
 0x6dd   :  { %v2533_v8 = vpop.eup %2532  ;;  %v864_v9 = vpop.xlane.xlu0 %863 }
 0x6de   :  { %v875_v10 = vmul.f32 %v2533_v8, %v872_v6  ;;  %v873_v11 = vmul.f32 %v3031_v4, %v864_v9  ;;  %v1061_v9 = vld [vmem:[%s3437_s6 + $0x28] sm:$0xff] }
 0x6df   :  { %1081 = vmatpush.msrb.mxu2 %v1061_v9 }
 0x6e0   :  { %v876_v12 = vmul.f32 %v2533_v8, %v875_v10  ;;  %2534 = vrsqrt.f32 %v873_v11  ;;  %vm893_vm9 = vcmp.eq.f32.partialorder %v873_v11, inf  ;;  %v896_v26 = vand.u32 2147483648, %v873_v11 }
 0x6e1   :  { %vm895_vm10 = vcmp.eq.f32.partialorder %v873_v11, 0.0 }
 0x6e2   :  { %v877_v1 = vmul.f32 0.5, %v876_v12 }
 0x6e4   :  { %v878_v13 = vsub.f32 1.5, %v877_v1  ;;  %v1060_v1 = vld [vmem:[%s3437_s6 + $0x20] sm:$0xff] }
 0x6e5   :  { %1082 = vmatpush.msrb.mxu2 %v1060_v1 }
 0x6e6   :  { %v2535_v14 = vpop.eup %2534  ;;  %v879_v16 = vmul.f32 %v2533_v8, %v878_v13 }
 0x6e7   :  { %v887_v56 = vmul.f32 %v2535_v14, %v873_v11 }
 0x6e8   :  { %v880_v18 = vmul.f32 %v879_v16, %v872_v6  ;;  %v1059_v16 = vld [vmem:[%s3437_s6 + $0x18] sm:$0xff] }
 0x6e9   :  { %v888_v20 = vmul.f32 %v2535_v14, %v887_v56  ;;  %1083 = vmatpush.msrb.mxu2 %v1059_v16 }
 0x6ea   :  { %v882_v21 = vsel %vm881_vm7, %v872_v6, %v880_v18 }
 0x6eb   :  { %v885_v22 = vsel %vm883_vm8, %v884_v19, %v882_v21  ;;  %v889_v23 = vmul.f32 0.5, %v888_v20  ;;  %v1058_v20 = vld [vmem:[%s3437_s6 + $0x10] sm:$0xff] }
 0x6ec   :  { %v898_v24 = vadd.f32 1e-08, %v885_v22  ;;  %1084 = vmatpush.msrb.mxu2 %v1058_v20 }
 0x6ed   :  { %v890_v15 = vsub.f32 1.5, %v889_v23 }
 0x6ee   :  { %2536 = vrcp.f32 %v898_v24  ;;  %v911_v33 = vand.u32 2147483648, %v898_v24  ;;  %v909_v35 = vand.u32 2147483647, %v898_v24  ;;  %vm905_vm12 = vweird.f32 %v898_v24 }
 0x6ef   :  { %v891_v17 = vmul.f32 %v2535_v14, %v890_v15 }
 0x6f0   :  { %v912_v37 = vor.u32 1.1754944e-38, %v911_v33  ;;  %vm910_vm14 = vcmp.eq.f32.partialorder %v909_v35, 8.507059e+37 }
 0x6f1   :  { %v892_v25 = vmul.f32 %v891_v17, %v873_v11 }
 0x6f3   :  { %v894_v27 = vsel %vm893_vm9, %v873_v11, %v892_v25 }
 0x6f4   :  { %v2537_v28 = vpop.eup %2536  ;;  %v897_v29 = vsel %vm895_vm10, %v896_v26, %v894_v27  ;;  %v1056_v27 = vld [vmem:[%s3437_s6] sm:$0xff] }
 0x6f5   :  { %v901_v30 = vmul.f32 %v2537_v28, %v898_v24  ;;  %v899_v31 = vadd.f32 1e-08, %v897_v29  ;;  %vm906_vm11 = vweird.f32 %v2537_v28  ;;  %v1057_v24 = vld [vmem:[%s3437_s6 + $0x8] sm:$0xff] }
 0x6f6   :  { %vm907_vm13 = vmor %vm905_vm12, %vm906_vm11  ;;  %1085 = vmatpush.msrb.mxu2 %v1057_v24 }
 0x6f7   :  { %v902_v32 = vsub.f32 1.0, %v901_v30  ;;  %2538 = vrcp.f32 %v899_v31  ;;  %v925_v49 = vand.u32 2147483648, %v899_v31  ;;  %v923_v52 = vand.u32 2147483647, %v899_v31 }
 0x6f8   :  { %vm919_vm0 = vweird.f32 %v899_v31  ;;  %1086 = vmatpush.msrb.mxu2 %v1056_v27 }
 0x6f9   :  { %v903_v34 = vmul.f32 %v2537_v28, %v902_v32  ;;  %v926_v55 = vor.u32 1.1754944e-38, %v925_v49  ;;  %vm924_vm6 = vcmp.eq.f32.partialorder %v923_v52, 8.507059e+37 }
 0x6fb   :  { %v904_v36 = vadd.f32 %v2537_v28, %v903_v34 }
 0x6fd   :  { %v2539_v39 = vpop.eup %2538  ;;  %v908_v40 = vsel %vm907_vm13, %v2537_v28, %v904_v36  ;;  %vm1064_vm13 = vcmask 523264  }
 0x6fe   :  { %v913_v42 = vsel %vm910_vm14, %v912_v37, %v908_v40  ;;  %v915_v43 = vmul.f32 %v2539_v39, %v899_v31  ;;  %vm920_vm15 = vweird.f32 %v2539_v39 }
 0x6ff   :  { %v928_v44 = vmul.f32 %v913_v42, %v3014_v48  ;;  %vm921_vm1 = vmor %vm919_vm0, %vm920_vm15 }
 0x700   :  { %v916_v45 = vsub.f32 1.0, %v915_v43 }
 0x701   :  { %v3045_v46 = vmul.f32 %v2493_v41, %v928_v44 }
 0x702   :  { %v917_v50 = vmul.f32 %v2539_v39, %v916_v45 }
 0x703   :  { %2345 = vmatmul.msk.f32.vlgmr.msra.gmra.mxu1 %vm145_vm2, %v3045_v46 }
 0x704   :  { %v918_v54 = vadd.f32 %v2539_v39, %v917_v50 }
 0x706   :  { %v922_v58 = vsel %vm921_vm1, %v2539_v39, %v918_v54 }
 0x707   :  { %v927_v47 = vsel %vm924_vm6, %v926_v55, %v922_v58 }
 0x708   :  { %v929_v60 = vmul.f32 %v927_v47, %v3020_v53 }
 0x70a   :  { %v3050_v48 = vmul.f32 %v2493_v41, %v929_v60 }
 0x70c   :  { %2346 = vmatmul.msk.f32.gmra.mxu1 %vm145_vm2, %v3050_v48 }
 0x780   :  { %v3054_v61 = vpop.f32.mrf.mxu1 }
 0x781   :  { %v3057_v63 = vmul.f32 0.70710677, %v3054_v61 }
 0x783   :  { %v972_v0 = vmul.f32 %v3057_v63, %v3057_v63 }
 0x785   :  { %v973_v3 = vmin.f32 %v972_v0, 16.0 }
 0x787   :  { %v974_v53 = vmul.f32 2.1237322e-06, %v973_v3  ;;  %v985_v5 = vmul.f32 3.8918573e-05, %v973_v3 }
 0x789   :  { %v975_v6 = vadd.f32 0.00028619796, %v974_v53  ;;  %v986_v7 = vadd.f32 0.001143296, %v985_v5  ;;  %v3067_v8 = vpop.f32.mrf.mxu1 }
 0x78a   :  { %v3073_v10 = vmul.f32 0.70710677, %v3067_v8  ;;  %v969_v27 = vmul.f32 0.5, %v3067_v8 }
 0x78b   :  { %v976_v11 = vmul.f32 %v975_v6, %v973_v3  ;;  %v987_v12 = vmul.f32 %v986_v7, %v973_v3 }
 0x78c   :  { %v1012_v13 = vmul.f32 %v3073_v10, %v3073_v10 }
 0x78d   :  { %v988_v14 = vadd.f32 0.014752088, %v987_v12  ;;  %v977_v56 = vadd.f32 0.0036580483, %v976_v11 }
 0x78e   :  { %v1013_v18 = vmin.f32 %v1012_v13, 16.0 }
 0x78f   :  { %v989_v19 = vmul.f32 %v988_v14, %v973_v3  ;;  %v978_v15 = vmul.f32 %v977_v56, %v973_v3 }
 0x790   :  { %v1014_v21 = vmul.f32 2.1237322e-06, %v1013_v18  ;;  %v1025_v22 = vmul.f32 3.8918573e-05, %v1013_v18 }
 0x791   :  { %v990_v23 = vadd.f32 0.112945676, %v989_v19  ;;  %v979_v31 = vadd.f32 0.05243302, %v978_v15 }
 0x792   :  { %v1015_v17 = vadd.f32 0.00028619796, %v1014_v21  ;;  %v1026_v25 = vadd.f32 0.001143296, %v1025_v22  ;;  %v968_v21 = vmul.f32 0.5, %v3054_v61 }
 0x793   :  { %v991_v26 = vmul.f32 %v990_v23, %v973_v3  ;;  %v980_v37 = vmul.f32 %v979_v31, %v973_v3 }
 0x794   :  { %v1016_v28 = vmul.f32 %v1015_v17, %v1013_v18  ;;  %v1027_v29 = vmul.f32 %v1026_v25, %v1013_v18 }
 0x795   :  { %v992_v30 = vadd.f32 0.4994258, %v991_v26  ;;  %v981_v42 = vadd.f32 0.18741608, %v980_v37  ;;  %v2354_v37 = vld [vmem:[%s3434_s3 + $0x50] sm:$0xff] }
 0x796   :  { %v1028_v32 = vadd.f32 0.014752088, %v1027_v29  ;;  %v1017_v34 = vadd.f32 0.0036580483, %v1016_v28 }
 0x797   :  { %v993_v33 = vmul.f32 %v992_v30, %v973_v3  ;;  %v982_v50 = vmul.f32 %v981_v42, %v973_v3  ;;  %v2352_v42 = vld [vmem:[%s3434_s3 + $0x40] sm:$0xff] }
 0x798   :  { %v1029_v35 = vmul.f32 %v1028_v32, %v1013_v18  ;;  %v1018_v40 = vmul.f32 %v1017_v34, %v1013_v18 }
 0x799   :  { %v994_v36 = vadd.f32 1.0, %v993_v33  ;;  %v983_v60 = vadd.f32 1.1283791, %v982_v50 }
 0x79a   :  { %v1030_v39 = vadd.f32 0.112945676, %v1029_v35  ;;  %v1019_v44 = vadd.f32 0.05243302, %v1018_v40  ;;  %v2359_v35 = vld [vmem:[%s3434_s3 + $0x78] sm:$0xff] }
 0x79b   :  { %2540 = vrcp.f32 %v994_v36  ;;  %v1006_v47 = vand.u32 2147483648, %v994_v36  ;;  %v1004_v51 = vand.u32 2147483647, %v994_v36  ;;  %vm1000_vm8 = vweird.f32 %v994_v36  ;;  %1219 = vmatpush.msrb.mxu0 %v2359_v35 }
 0x79c   :  { %v1031_v41 = vmul.f32 %v1030_v39, %v1013_v18  ;;  %v1020_v55 = vmul.f32 %v1019_v44, %v1013_v18  ;;  %v984_v7 = vmul.f32 %v983_v60, %v3057_v63  ;;  %v2355_v39 = vld [vmem:[%s3434_s3 + $0x58] sm:$0xff] }
 0x79d   :  { %v1007_v38 = vor.u32 1.1754944e-38, %v1006_v47  ;;  %vm1005_vm10 = vcmp.eq.f32.partialorder %v1004_v51, 8.507059e+37 }
 0x79e   :  { %v1032_v43 = vadd.f32 0.4994258, %v1031_v41  ;;  %v1021_v53 = vadd.f32 0.18741608, %v1020_v55 }
 0x7a0   :  { %v1033_v45 = vmul.f32 %v1032_v43, %v1013_v18  ;;  %v1022_v11 = vmul.f32 %v1021_v53, %v1013_v18  ;;  %v2353_v43 = vld [vmem:[%s3434_s3 + $0x48] sm:$0xff] }
 0x7a1   :  { %v2541_v49 = vpop.eup %2540 }
 0x7a2   :  { %v996_v52 = vmul.f32 %v2541_v49, %v994_v36  ;;  %v1034_v54 = vadd.f32 1.0, %v1033_v45  ;;  %vm1001_vm7 = vweird.f32 %v2541_v49  ;;  %v1023_v56 = vadd.f32 1.1283791, %v1022_v11  ;;  %v2356_v36 = vld [vmem:[%s3434_s3 + $0x60] sm:$0xff] }
 0x7a3   :  { %vm1002_vm9 = vmor %vm1000_vm8, %vm1001_vm7 }
 0x7a4   :  { %v997_v58 = vsub.f32 1.0, %v996_v52  ;;  %2542 = vrcp.f32 %v1034_v54  ;;  %v1046_v16 = vand.u32 2147483648, %v1034_v54  ;;  %v1044_v20 = vand.u32 2147483647, %v1034_v54 }
 0x7a5   :  { %vm1040_vm12 = vweird.f32 %v1034_v54  ;;  %v1024_v18 = vmul.f32 %v1023_v56, %v3073_v10 }
 0x7a6   :  { %v998_v0 = vmul.f32 %v2541_v49, %v997_v58  ;;  %v1047_v24 = vor.u32 1.1754944e-38, %v1046_v16  ;;  %vm1045_vm15 = vcmp.eq.f32.partialorder %v1044_v20, 8.507059e+37 }
 0x7a8   :  { %v999_v5 = vadd.f32 %v2541_v49, %v998_v0 }
 0x7aa   :  { %v2543_v6 = vpop.eup %2542  ;;  %v1003_v9 = vsel %vm1002_vm9, %v2541_v49, %v999_v5 }
 0x7ab   :  { %v1008_v3 = vsel %vm1005_vm10, %v1007_v38, %v1003_v9  ;;  %v1036_v12 = vmul.f32 %v2543_v6, %v1034_v54  ;;  %vm1041_vm11 = vweird.f32 %v2543_v6 }
 0x7ac   :  { %v1009_v1 = vmul.f32 %v1008_v3, %v984_v7  ;;  %vm1042_vm14 = vmor %vm1040_vm12, %vm1041_vm11 }
 0x7ad   :  { %v1037_v13 = vsub.f32 1.0, %v1036_v12 }
 0x7ae   :  { %v2347_v14 = vclamps-f32 %v1009_v1, 1.0 }
 0x7af   :  { %v1038_v19 = vmul.f32 %v2543_v6, %v1037_v13 }
 0x7b0   :  { %v1052_v22 = vadd.f32 1.0, %v2347_v14 }
 0x7b1   :  { %v1039_v23 = vadd.f32 %v2543_v6, %v1038_v19 }
 0x7b2   :  { %v1054_v63 = vmul.f32 %v1052_v22, %v968_v21 }
 0x7b3   :  { %v1043_v15 = vsel %vm1042_vm14, %v2543_v6, %v1039_v23 }
 0x7b4   :  { %v1048_v17 = vsel %vm1045_vm15, %v1047_v24, %v1043_v15  ;;  %2349 = vmatmul.msk.f32.vlgmr.msrb.gmra.mxu2 %vm1064_vm13, %v1054_v63  ;;  %v2494_v15 = vld [vmem:[%s3438_s7 + $0x1] ss:$0 sm:$0xff] }
 0x7b5   :  { %v1049_v25 = vmul.f32 %v1048_v17, %v1024_v18 }
 0x7b7   :  { %v2348_v26 = vclamps-f32 %v1049_v25, 1.0 }
 0x7b9   :  { %v1053_v28 = vadd.f32 1.0, %v2348_v26 }
 0x7bb   :  { %v1055_v61 = vmul.f32 %v1053_v28, %v969_v27 }
 0x7bd   :  { %2350 = vmatmul.msk.f32.gmra.mxu2 %vm1064_vm13, %v1055_v61 }
 0x837   :  { %v1088_v29 = vpop.f32.mrf.mxu2 }
 0x838   :  { %v3099_v30 = vadd.f32 %v1088_v29, %v3045_v46  ;;  %v2358_v46 = vld [vmem:[%s3434_s3 + $0x70] sm:$0xff] }
 0x839   :  { %1196 = vmatpush.msra.mxu3 %v2358_v46 }
 0x83a   :  { %v1098_v10 = vmul.f32 %v3099_v30, %v3099_v30 }
 0x83b   :  { %1197 = vmatpush.msra.mxu3 %v2356_v36  ;;  %v2612_v36 = vld [vmem:[%s3433_s2 + $0x30] sm:$0xff] }
 0x83c   :  { %v1100_v31 = vsel %vm145_vm2, %v1098_v10, 0.0 }
 0x83d   :  { %1101 = vadd.xlane.f32.xlu1 %v1100_v31  ;;  %1198 = vmatpush.msra.mxu3 %v2354_v37 }
 0x83f   :  { %1199 = vmatpush.msra.mxu3 %v2352_v42 }
 0x840   :  { %v1091_v32 = vpop.f32.mrf.mxu2 }
 0x841   :  { %v3105_v33 = vadd.f32 %v1091_v32, %v3050_v48  ;;  %v2357_v48 = vld [vmem:[%s3434_s3 + $0x68] sm:$0xff] }
 0x842   :  { %1220 = vmatpush.msrb.mxu0 %v2357_v48 }
 0x843   :  { %v1099_v8 = vmul.f32 %v3105_v33, %v3105_v33 }
 0x844   :  { %1221 = vmatpush.msrb.mxu0 %v2355_v39 }
 0x845   :  { %v1103_v34 = vsel %vm145_vm2, %v1099_v8, 0.0 }
 0x846   :  { %1104 = vadd.xlane.f32.xlu2 %v1103_v34  ;;  %1222 = vmatpush.msrb.mxu0 %v2353_v43 }
 0x8b0   :  { %v1102_v40 = vpop.xlane.xlu1 %1101 }
 0x8b1   :  { %v1106_v41 = vmul.f32 %v1102_v40, %v3031_v4  ;;  %v2613_v40 = vld [vmem:[%s3433_s2 + $0x38] sm:$0xff] }
 0x8b3   :  { %2544 = vrsqrt.f32 %v1106_v41  ;;  %vm1115_vm0 = vcmp.eq.f32.partialorder %v1106_v41, inf  ;;  %v1118_v51 = vand.u32 2147483648, %v1106_v41  ;;  %vm1117_vm1 = vcmp.eq.f32.partialorder %v1106_v41, 0.0 }
 0x8b9   :  { %v2545_v44 = vpop.eup %2544  ;;  %v1105_v45 = vpop.xlane.xlu2 %1104 }
 0x8ba   :  { %v1109_v49 = vmul.f32 %v2545_v44, %v1106_v41  ;;  %v1107_v50 = vmul.f32 %v1105_v45, %v3031_v4 }
 0x8bc   :  { %v1110_v52 = vmul.f32 %v2545_v44, %v1109_v49  ;;  %2546 = vrsqrt.f32 %v1107_v50  ;;  %vm1127_vm6 = vcmp.eq.f32.partialorder %v1107_v50, inf  ;;  %v1130_v12 = vand.u32 2147483648, %v1107_v50 }
 0x8bd   :  { %vm1129_vm7 = vcmp.eq.f32.partialorder %v1107_v50, 0.0 }
 0x8be   :  { %v1111_v54 = vmul.f32 0.5, %v1110_v52 }
 0x8c0   :  { %v1112_v55 = vsub.f32 1.5, %v1111_v54 }
 0x8c2   :  { %v2547_v58 = vpop.eup %2546  ;;  %v1113_v47 = vmul.f32 %v2545_v44, %v1112_v55 }
 0x8c3   :  { %v1121_v60 = vmul.f32 %v2547_v58, %v1107_v50 }
 0x8c4   :  { %v1114_v0 = vmul.f32 %v1113_v47, %v1106_v41 }
 0x8c5   :  { %v1122_v53 = vmul.f32 %v2547_v58, %v1121_v60 }
 0x8c6   :  { %v1116_v5 = vsel %vm1115_vm0, %v1106_v41, %v1114_v0 }
 0x8c7   :  { %v1119_v38 = vsel %vm1117_vm1, %v1118_v51, %v1116_v5  ;;  %v1123_v6 = vmul.f32 0.5, %v1122_v53 }
 0x8c8   :  { %v1132_v7 = vadd.f32 1e-08, %v1119_v38 }
 0x8c9   :  { %v1124_v9 = vsub.f32 1.5, %v1123_v6 }
 0x8ca   :  { %2548 = vrcp.f32 %v1132_v7  ;;  %v1145_v20 = vand.u32 2147483648, %v1132_v7  ;;  %v1143_v22 = vand.u32 2147483647, %v1132_v7  ;;  %vm1139_vm9 = vweird.f32 %v1132_v7 }
 0x8cb   :  { %v1125_v3 = vmul.f32 %v2547_v58, %v1124_v9  ;;  %v2615_v58 = vld [vmem:[%s3433_s2 + $0x28] sm:$0xff] }
 0x8cc   :  { %v1146_v63 = vor.u32 1.1754944e-38, %v1145_v20  ;;  %vm1144_vm11 = vcmp.eq.f32.partialorder %v1143_v22, 8.507059e+37 }
 0x8cd   :  { %v1126_v11 = vmul.f32 %v1125_v3, %v1107_v50 }
 0x8cf   :  { %v1128_v1 = vsel %vm1127_vm6, %v1107_v50, %v1126_v11 }
 0x8d0   :  { %v2549_v13 = vpop.eup %2548  ;;  %v1131_v14 = vsel %vm1129_vm7, %v1130_v12, %v1128_v1 }
 0x8d1   :  { %v1135_v16 = vmul.f32 %v2549_v13, %v1132_v7  ;;  %v1133_v56 = vadd.f32 1e-08, %v1131_v14  ;;  %vm1140_vm8 = vweird.f32 %v2549_v13 }
 0x8d2   :  { %vm1141_vm10 = vmor %vm1139_vm9, %vm1140_vm8 }
 0x8d3   :  { %v1136_v19 = vsub.f32 1.0, %v1135_v16  ;;  %2550 = vrcp.f32 %v1133_v56  ;;  %v1159_v61 = vand.u32 2147483648, %v1133_v56  ;;  %v1157_v10 = vand.u32 2147483647, %v1133_v56 }
 0x8d4   :  { %vm1153_vm14 = vweird.f32 %v1133_v56 }
 0x8d5   :  { %v1137_v21 = vmul.f32 %v2549_v13, %v1136_v19  ;;  %v1160_v32 = vor.u32 1.1754944e-38, %v1159_v61  ;;  %vm1158_vm0 = vcmp.eq.f32.partialorder %v1157_v10, 8.507059e+37 }
 0x8d7   :  { %v1138_v23 = vadd.f32 %v2549_v13, %v1137_v21 }
 0x8d9   :  { %v2551_v24 = vpop.eup %2550  ;;  %v1142_v18 = vsel %vm1141_vm10, %v2549_v13, %v1138_v23 }
 0x8da   :  { %v1147_v17 = vsel %vm1144_vm11, %v1146_v63, %v1142_v18  ;;  %v1149_v25 = vmul.f32 %v2551_v24, %v1133_v56  ;;  %vm1154_vm12 = vweird.f32 %v2551_v24 }
 0x8db   :  { %v1162_v26 = vmul.f32 %v1147_v17, %v3099_v30  ;;  %vm1155_vm15 = vmor %vm1153_vm14, %vm1154_vm12 }
 0x8dc   :  { %v1150_v27 = vsub.f32 1.0, %v1149_v25 }
 0x8dd   :  { %v3140_v28 = vmul.f32 %v2494_v15, %v1162_v26 }
 0x8de   :  { %v1151_v29 = vmul.f32 %v2551_v24, %v1150_v27 }
 0x8df   :  { %2360 = vmatmul.msk.f32.vlgmr.msra.gmra.mxu3 %vm145_vm2, %v3140_v28  ;;  %2362 = vmatmul.msk.f32.vlgmr.msrb.gmra.mxu0 %vm145_vm2, %v3140_v28 }
 0x8e0   :  { %v1152_v31 = vadd.f32 %v2551_v24, %v1151_v29 }
 0x8e2   :  { %v1156_v8 = vsel %vm1155_vm15, %v2551_v24, %v1152_v31 }
 0x8e3   :  { %v1161_v30 = vsel %vm1158_vm0, %v1160_v32, %v1156_v8 }
 0x8e4   :  { %v1163_v34 = vmul.f32 %v1161_v30, %v3105_v33 }
 0x8e6   :  { %v3147_v46 = vmul.f32 %v2494_v15, %v1163_v34 }
 0x8e8   :  { %2361 = vmatmul.msk.f32.gmra.mxu3 %vm145_vm2, %v3147_v46  ;;  %2363 = vmatmul.msk.f32.gmra.mxu0 %vm145_vm2, %v3147_v46 }
 0x95c   :  { %v1224_v35 = vpop.f32.mrf.mxu0 }
 0x95d   :  { %v1246_v48 = vmul.f32 %v2612_v36, %v1224_v35 }
 0x95f   :  { %1250 = vrot.lane.b32.xlu0 %v1246_v48, %s2672_s11 }
 0x962   :  { %v3157_v37 = vpop.f32.mrf.mxu3 }
 0x963   :  { %v1232_v33 = vmul.f32 %v3157_v37, %v2865_v57  ;;  %v1244_v44 = vmul.f32 %v3157_v37, %v2877_v62  ;;  %v2614_v62 = vld [vmem:[%s3433_s2 + $0x20] sm:$0xff] }
 0x964   :  { %v1230_v54 = vmul.f32 %v2614_v62, %v3157_v37 }
 0x965   :  { %v1227_v39 = vpop.f32.mrf.mxu0 }
 0x966   :  { %v1247_v41 = vmul.f32 %v2613_v40, %v1227_v39 }
 0x967   :  { %1236 = vrot.lane.b32.xlu0 %v1232_v33, %s2672_s11 }
 0x968   :  { %1252 = vrot.lane.b32.xlu1 %v1247_v41, %s2672_s11 }
 0x96b   :  { %v3166_v42 = vpop.f32.mrf.mxu3 }
 0x96c   :  { %v1233_v43 = vmul.f32 %v3166_v42, %v2870_v59  ;;  %v1245_v49 = vmul.f32 %v3166_v42, %v2882_v2  ;;  %v1231_v47 = vmul.f32 %v2615_v58, %v3166_v42  ;;  %v2463_v38 = vpack.i.bf16 %v3166_v42, %v3157_v37 }
 0x96f   :  { %1238 = vrot.lane.b32.xlu0 %v1233_v43, %s2672_s11 }
 0x9d1   :  { %v1251_v57 = vpop.permute.xlu0 %1250 }
 0x9d2   :  { %v1256_v45 = vadd.f32 %v1251_v57, %v1244_v44 }
 0x9d4   :  { %1278 = vrot.lane.b32.xlu2 %v1256_v45, %s2676_s22  ;;  %1282 = vrot.lane.b32.xlu0 %v1256_v45, %s2677_s23 }
 0x9d9   :  { %v1237_v59 = vpop.permute.xlu0 %1236 }
 0x9da   :  { %v1253_v50 = vpop.permute.xlu1 %1252  ;;  %v1242_v55 = vadd.f32 %v1237_v59, %v1230_v54 }
 0x9db   :  { %v1257_v52 = vadd.f32 %v1253_v50, %v1245_v49 }
 0x9dc   :  { %1274 = vrot.lane.b32.xlu2 %v1256_v45, %s2675_s21  ;;  %1300 = vrot.lane.b32.xlu0 %v1256_v45, %s2674_s25 }
 0x9dd   :  { %1276 = vrot.lane.b32.xlu1 %v1257_v52, %s2675_s21 }
 0x9e1   :  { %v1239_v2 = vpop.permute.xlu0 %1238 }
 0x9e2   :  { %v1243_v60 = vadd.f32 %v1239_v2, %v1231_v47 }
 0x9e4   :  { %1280 = vrot.lane.b32.xlu2 %v1257_v52, %s2676_s22  ;;  %1264 = vrot.lane.b32.xlu0 %v1242_v55, %s2676_s22 }
 0x9e5   :  { %1284 = vrot.lane.b32.xlu1 %v1257_v52, %s2677_s23 }
 0x9ec   :  { %1260 = vrot.lane.b32.xlu0 %v1242_v55, %s2675_s21  ;;  %1262 = vrot.lane.b32.xlu2 %v1243_v60, %s2675_s21 }
 0x9ed   :  { %1326 = vrot.lane.b32.xlu1 %v1257_v52, %s2674_s25 }
 0xa2e   :  { %v1279_v0 = vpop.permute.xlu2 %1278 }
 0xa2f   :  { %1404 = vrot.lane.b32.xlu2 %v1279_v0, %s2674_s25 }
 0xa36   :  { %v1275_v6 = vpop.permute.xlu2 %1274 }
 0xa3e   :  { %v1281_v3 = vpop.permute.xlu2 %1280 }
 0xa46   :  { %v1283_v51 = vpop.permute.xlu0 %1282  ;;  %v1263_v11 = vpop.permute.xlu2 %1262 }
 0xa47   :  { %1456 = vrot.lane.b32.xlu0 %v1283_v51, %s2674_s25 }
 0xa4e   :  { %v1301_v53 = vpop.permute.xlu0 %1300 }
 0xa4f   :  { %v1277_v5 = vpop.permute.xlu1 %1276  ;;  %2364 = vmatpush.xpose.msk.msrb.mxu1 %vm286_vm3, %v1301_v53  ;;  %1266 = vrot.lane.b32.xlu0 %v1243_v60, %s2676_s22 }
 0xa50   :  { %1378 = vrot.lane.b32.xlu1 %v1277_v5, %s2674_s25 }
 0xa52   :  { %2365 = vmatmul.msk.f32.vlgmr.msrb.gmra.mxu1 %vm286_vm3, %v1242_v55 }
 0xa56   :  { %v1265_v1 = vpop.permute.xlu0 %1264 }
 0xa57   :  { %v1285_v7 = vpop.permute.xlu1 %1284  ;;  %2464 = vrot.lane.b32.xlu0 %v2463_v38, %s2675_s21 }
 0xa58   :  { %1352 = vrot.lane.b32.xlu1 %v1275_v6, %s2674_s25  ;;  %1482 = vrot.lane.b32.xlu2 %v1285_v7, %s2674_s25 }
 0xa5e   :  { %v1261_v14 = vpop.permute.xlu0 %1260 }
 0xa5f   :  { %v1327_v9 = vpop.permute.xlu1 %1326 }
 0xa60   :  { %2366 = vmatpush.xpose.msk.msrb.mxu3 %vm286_vm3, %v1327_v9  ;;  %1270 = vrot.lane.b32.xlu1 %v1243_v60, %s2677_s23 }
 0xa61   :  { %1268 = vrot.lane.b32.xlu2 %v1242_v55, %s2677_s23 }
 0xa63   :  { %2367 = vmatmul.msk.f32.vlgmr.msrb.gmra.mxu3 %vm286_vm3, %v1243_v60 }
 0xa68   :  { %1430 = vrot.lane.b32.xlu1 %v1281_v3, %s2674_s25 }
 0xa69   :  { %2469 = vrot.lane.b32.xlu2 %v2463_v38, %s2676_s22 }
 0xa70   :  { %2474 = vrot.lane.b32.xlu1 %v2463_v38, %s2677_s23 }
 0xa89   :  { %v1405_v12 = vpop.permute.xlu2 %1404 }
 0xa8a   :  { %2372 = vmatpush.xpose.msk.msra.mxu3 %vm286_vm3, %v1405_v12 }
 0xa8d   :  { %2373 = vmatmul.msk.f32.vlgmr.msra.gmra.mxu3 %vm286_vm3, %v1265_v1 }
 0xab2   :  { %v1483_v16 = vpop.permute.xlu2 %1482 }
 0xab9   :  { %v1457_v19 = vpop.permute.xlu0 %1456 }
 0xabb   :  { %v1269_v23 = vpop.permute.xlu2 %1268 }
 0xac1   :  { %v1267_v24 = vpop.permute.xlu0 %1266 }
 0xac2   :  { %v1379_v13 = vpop.permute.xlu1 %1378 }
 0xac3   :  { %2370 = vmatpush.xpose.msk.msra.mxu2 %vm286_vm3, %v1379_v13  ;;  %v3227_v26 = vpop.permute.xlu2 %2469 }
 0xac6   :  { %2371 = vmatmul.msk.f32.vlgmr.msra.gmra.mxu2 %vm286_vm3, %v1263_v11 }
 0xac7   :  { %2378 = vmatpush.xpose.msk.msrb.mxu2 %vm286_vm3, %v1483_v16 }
 0xac9   :  { %v3245_v49 = vpop.permute.xlu0 %2464 }
 0xaca   :  { %v1353_v56 = vpop.permute.xlu1 %1352  ;;  %v2466_v52 = vunpack.i.l.bf16 %v3245_v49 }
 0xacb   :  { %2368 = vmatpush.xpose.msk.msra.mxu1 %vm286_vm3, %v1353_v56 }
 0xacc   :  { %v2478_v59 = vpack.i.bf16 %v2466_v52, %v3157_v37 }
 0xace   :  { %2369 = vmatmul.msk.f32.vlgmr.msra.gmra.mxu1 %vm286_vm3, %v1261_v14 }
 0xacf   :  { %2376 = vmatpush.xpose.msk.msrb.mxu1 %vm286_vm3, %v1457_v19  ;;  %v1323_v20 = vpop.f32.mrf.mxu1 }
 0xad0   :  { %v1508_v21 = vsel %vm286_vm3, %v1323_v20, -inf }
 0xad1   :  { %1509 = vmax.xlane.f32.xlu2 %v1508_v21 }
 0xad2   :  { %v1271_v22 = vpop.permute.xlu1 %1270 }
 0xad3   :  { %2379 = vmatmul.msk.f32.vlgmr.msrb.gmra.mxu2 %vm286_vm3, %v1271_v22 }
 0xad6   :  { %2377 = vmatmul.msk.f32.vlgmr.msrb.gmra.mxu1 %vm286_vm3, %v1269_v23 }
 0xada   :  { %v1431_v63 = vpop.permute.xlu1 %1430 }
 0xadb   :  { %2374 = vmatpush.xpose.msk.msra.mxu0 %vm286_vm3, %v1431_v63 }
 0xade   :  { %2375 = vmatmul.msk.f32.vlgmr.msra.gmra.mxu0 %vm286_vm3, %v1267_v24 }
 0xae2   :  { %v3234_v30 = vpop.permute.xlu1 %2474 }
 0xae6   :  { %v1349_v18 = vpop.f32.mrf.mxu3 }
 0xae7   :  { %v1511_v15 = vsel %vm286_vm3, %v1349_v18, -inf }
 0xae8   :  { %1512 = vmax.xlane.f32.xlu1 %v1511_v15 }
 0xb10   :  { %v1427_v17 = vpop.f32.mrf.mxu3 }
 0xb11   :  { %v1520_v25 = vsel %vm286_vm3, %v1427_v17, -inf }
 0xb12   :  { %1521 = vmax.xlane.f32.xlu0 %v1520_v25 }
 0xb44   :  { %v1510_v27 = vpop.xlane.xlu2 %1509 }
 0xb45   :  { %v1532_v10 = vsub.f32 %v1323_v20, %v1510_v27 }
 0xb47   :  { %v1540_v8 = vmul.f32 1.442695, %v1532_v10  ;;  %v2471_v10 = vunpack.i.l.bf16 %v3227_v26 }
 0xb49   :  { %v3229_v61 = vpop.f32.mrf.mxu2  ;;  %2552 = vpow2.f32 %v1540_v8 }
 0xb4a   :  { %v1517_v29 = vsel %vm286_vm3, %v3229_v61, -inf }
 0xb4b   :  { %v1375_v31 = vpop.f32.mrf.mxu1  ;;  %1518 = vmax.xlane.f32.xlu2 %v1517_v29 }
 0xb4c   :  { %v1514_v32 = vsel %vm286_vm3, %v1375_v31, -inf }
 0xb4d   :  { %1515 = vmax.xlane.f32.xlu1 %v1514_v32 }
 0xb4f   :  { %v2553_v39 = vpop.eup %2552 }
 0xb50   :  { %v1556_v44 = vsel %vm286_vm3, %v2553_v39, 0.0 }
 0xb53   :  { %v1479_v34 = vpop.f32.mrf.mxu1 }
 0xb54   :  { %v1526_v35 = vsel %vm286_vm3, %v1479_v34, -inf }
 0xb55   :  { %1527 = vmax.xlane.f32.xlu0 %v1526_v35 }
 0xb56   :  { %v3237_v36 = vpop.f32.mrf.mxu2 }
 0xb57   :  { %v1529_v48 = vsel %vm286_vm3, %v3237_v36, -inf }
 0xb58   :  { %1530 = vmax.xlane.f32.xlu2 %v1529_v48 }
 0xb5b   :  { %v1453_v33 = vpop.f32.mrf.mxu0  ;;  %v1513_v40 = vpop.xlane.xlu1 %1512 }
 0xb5c   :  { %v1533_v41 = vsub.f32 %v1349_v18, %v1513_v40  ;;  %v1523_v43 = vsel %vm286_vm3, %v1453_v33, -inf  ;;  %v2476_v18 = vunpack.i.l.bf16 %v3234_v30 }
 0xb5d   :  { %1524 = vmax.xlane.f32.xlu1 %v1523_v43  ;;  %1557 = vadd.xlane.f32.xlu0 %v1556_v44 }
 0xb5e   :  { %v1542_v57 = vmul.f32 1.442695, %v1533_v41  ;;  %v2488_v25 = vpack.i.bf16 %v2476_v18, %v3166_v42  ;;  %v2477_v42 = vunpack.i.h.bf16 %v3234_v30 }
 0xb60   :  { %2554 = vpow2.f32 %v1542_v57 }
 0xb66   :  { %v3243_v45 = vpop.eup %2554 }
 0xb67   :  { %v1559_v50 = vsel %vm286_vm3, %v3243_v45, 0.0 }
 0xb68   :  { %1560 = vadd.xlane.f32.xlu0 %v1559_v50 }
 0xb70   :  { %2479 = vrot.lane.b32.xlu2 %v2478_v59, %s2678_s24 }
 0xb85   :  { %v1522_v62 = vpop.xlane.xlu0 %1521 }
 0xb86   :  { %v1536_v54 = vsub.f32 %v1427_v17, %v1522_v62 }
 0xb88   :  { %v1548_v55 = vmul.f32 1.442695, %v1536_v54 }
 0xb8a   :  { %2556 = vpow2.f32 %v1548_v55 }
 0xb90   :  { %v3252_v2 = vpop.eup %2556 }
 0xb91   :  { %v1568_v58 = vsel %vm286_vm3, %v3252_v2, 0.0 }
 0xb92   :  { %1569 = vadd.xlane.f32.xlu1 %v1568_v58 }
 0xbbe   :  { %v1519_v0 = vpop.xlane.xlu2 %1518 }
 0xbbf   :  { %v1535_v1 = vsub.f32 %v3229_v61, %v1519_v0  ;;  %v2467_v61 = vunpack.i.h.bf16 %v3245_v49 }
 0xbc0   :  { %v1516_v47 = vpop.xlane.xlu1 %1515 }
 0xbc1   :  { %v1534_v60 = vsub.f32 %v1375_v31, %v1516_v47  ;;  %v1546_v21 = vmul.f32 1.442695, %v1535_v1  ;;  %v2472_v31 = vunpack.i.h.bf16 %v3227_v26  ;;  %v2483_v32 = vpack.i.bf16 %v2467_v61, %v2471_v10  ;;  %v2391_v1 = vld [vmem:[%s3435_s4 + $0x38] sm:$0xff] }
 0xbc3   :  { %v1544_v51 = vmul.f32 1.442695, %v1534_v60 }
 0xbc5   :  { %2558 = vpow2.f32 %v1544_v51 }
 0xbc8   :  { %v1528_v53 = vpop.xlane.xlu0 %1527 }
 0xbc9   :  { %v1538_v5 = vsub.f32 %v1479_v34, %v1528_v53 }
 0xbcb   :  { %v2559_v37 = vpop.eup %2558  ;;  %v1552_v38 = vmul.f32 1.442695, %v1538_v5  ;;  %v1531_v6 = vpop.xlane.xlu2 %1530 }
 0xbcc   :  { %v1562_v7 = vsel %vm286_vm3, %v2559_v37, 0.0  ;;  %v1539_v63 = vsub.f32 %v3237_v36, %v1531_v6 }
 0xbcd   :  { %2560 = vpow2.f32 %v1552_v38  ;;  %1563 = vadd.xlane.f32.xlu2 %v1562_v7 }
 0xbce   :  { %v1554_v15 = vmul.f32 1.442695, %v1539_v63 }
 0xbd0   :  { %v1525_v9 = vpop.xlane.xlu1 %1524  ;;  %v1558_v3 = vpop.xlane.xlu0 %1557 }
 0xbd1   :  { %v1537_v11 = vsub.f32 %v1453_v33, %v1525_v9  ;;  %2562 = vrcp.f32 %v1558_v3 }
 0xbd3   :  { %v2561_v12 = vpop.eup %2560  ;;  %v1550_v13 = vmul.f32 1.442695, %v1537_v11  ;;  %v2480_v14 = vpop.permute.xlu2 %2479 }
 0xbd4   :  { %v2482_v16 = vunpack.i.h.bf16 %v2480_v14  ;;  %v2481_v56 = vunpack.i.l.bf16 %v2480_v14  ;;  %v1574_v19 = vsel %vm286_vm3, %v2561_v12, 0.0  ;;  %v2389_v14 = vld [vmem:[%s3435_s4 + $0x28] sm:$0xff] }
 0xbd5   :  { %2564 = vpow2.f32 %v1550_v13  ;;  %1575 = vadd.xlane.f32.xlu1 %v1574_v19  ;;  %v2390_v13 = vld [vmem:[%s3435_s4 + $0x30] sm:$0xff] }
 0xbd6   :  { %1617 = vmatpush.msrb.mxu3 %v2481_v56  ;;  %1669 = vmatpush.msra.mxu1 %v2482_v16  ;;  %2566 = vpow2.f32 %v1546_v21  ;;  %v2388_v16 = vld [vmem:[%s3435_s4 + $0x20] sm:$0xff] }
 0xbd7   :  { %v2563_v20 = vpop.eup %2562  ;;  %2568 = vpow2.f32 %v1554_v15 }
 0xbd8   :  { %v1588_v22 = vmul.f32 %v2563_v20, %v2553_v39 }
 0xbda   :  { %2380 = vmatmul.msk.f32.vlgmr.msrb.gmra.mxu3 %vm286_vm3, %v1588_v22 }
 0xbdb   :  { %v2565_v23 = vpop.eup %2564  ;;  %v1561_v34 = vpop.xlane.xlu0 %1560 }
 0xbdc   :  { %v1571_v24 = vsel %vm286_vm3, %v2565_v23, 0.0  ;;  %v2567_v17 = vpop.eup %2566  ;;  %2570 = vrcp.f32 %v1561_v34  ;;  %v2397_v34 = vld [vmem:[%s3436_s5 + $0x30] sm:$0xff] }
 0xbdd   :  { %1572 = vadd.xlane.f32.xlu0 %v1571_v24  ;;  %v1565_v27 = vsel %vm286_vm3, %v2567_v17, 0.0  ;;  %v2569_v29 = vpop.eup %2568 }
 0xbde   :  { %v1577_v8 = vsel %vm286_vm3, %v2569_v29, 0.0 }
 0xbe2   :  { %v2571_v48 = vpop.eup %2570 }
 0xbe3   :  { %v1589_v44 = vmul.f32 %v2571_v48, %v3243_v45 }
 0xbe5   :  { %2489 = vrot.lane.b32.xlu2 %v2488_v25, %s2678_s24  ;;  %1566 = vadd.xlane.f32.xlu0 %v1565_v27 }
 0xbed   :  { %1726 = vrot.lane.b32.xlu2 %v2472_v31, %s2678_s24  ;;  %1578 = vadd.xlane.f32.xlu0 %v1577_v8 }
 0xbee   :  { %2484 = vrot.lane.b32.xlu1 %v2483_v32, %s2678_s24 }
 0xc01   :  { %1778 = vrot.lane.b32.xlu0 %v2477_v42, %s2678_s24 }
 0xc05   :  { %v1570_v35 = vpop.xlane.xlu1 %1569 }
 0xc40   :  { %v1564_v36 = vpop.xlane.xlu2 %1563 }
 0xc41   :  { %2572 = vrcp.f32 %v1564_v36  ;;  %v2395_v36 = vld [vmem:[%s3436_s5 + $0x20] sm:$0xff] }
 0xc47   :  { %v2573_v39 = vpop.eup %2572 }
 0xc48   :  { %v1590_v26 = vmul.f32 %v2573_v39, %v2559_v37  ;;  %v2490_v33 = vpop.permute.xlu2 %2489  ;;  %v1576_v40 = vpop.xlane.xlu1 %1575 }
 0xc49   :  { %v2492_v41 = vunpack.i.h.bf16 %v2490_v33  ;;  %v2491_v43 = vunpack.i.l.bf16 %v2490_v33  ;;  %2574 = vrcp.f32 %v1576_v40 }
 0xc4a   :  { %2382 = vmatmul.msk.f32.vlgmr.msra.gmra.mxu1 %vm286_vm3, %v1590_v26 }
 0xc4b   :  { %1643 = vmatpush.msrb.mxu0 %v2491_v43  ;;  %1773 = vmatpush.msrb.mxu1 %v2492_v41 }
 0xc4c   :  { %2381 = vmatmul.msk.f32.vlgmr.msrb.gmra.mxu0 %vm286_vm3, %v1589_v44 }
 0xc4f   :  { %v2575_v30 = vpop.eup %2574 }
 0xc50   :  { %v1594_v57 = vmul.f32 %v2575_v30, %v2561_v12  ;;  %v1727_v49 = vpop.permute.xlu2 %1726  ;;  %v1573_v50 = vpop.xlane.xlu0 %1572 }
 0xc51   :  { %2576 = vrcp.f32 %v1573_v50  ;;  %1747 = vmatpush.msra.mxu0 %v1727_v49 }
 0xc52   :  { %2386 = vmatmul.msk.f32.vlgmr.msrb.gmra.mxu1 %vm286_vm3, %v1594_v57  ;;  %2578 = vrcp.f32 %v1570_v35 }
 0xc57   :  { %v2577_v52 = vpop.eup %2576 }
 0xc58   :  { %v1593_v59 = vmul.f32 %v2577_v52, %v2565_v23  ;;  %v1567_v62 = vpop.xlane.xlu0 %1566  ;;  %v2579_v45 = vpop.eup %2578 }
 0xc59   :  { %2580 = vrcp.f32 %v1567_v62  ;;  %v1592_v60 = vmul.f32 %v2579_v45, %v3252_v2 }
 0xc5a   :  { %2385 = vmatmul.msk.f32.vlgmr.msra.gmra.mxu0 %vm286_vm3, %v1593_v59 }
 0xc5d   :  { %v1619_v2 = vpop.f32.mrf.mxu3 }
 0xc5f   :  { %v2581_v54 = vpop.eup %2580 }
 0xc60   :  { %v2485_v55 = vpop.permute.xlu1 %2484  ;;  %v1591_v0 = vmul.f32 %v2581_v54, %v2567_v17  ;;  %v1579_v51 = vpop.xlane.xlu0 %1578 }
 0xc61   :  { %v2487_v58 = vunpack.i.h.bf16 %v2485_v55  ;;  %v2486_v47 = vunpack.i.l.bf16 %v2485_v55  ;;  %2582 = vrcp.f32 %v1579_v51 }
 0xc63   :  { %1695 = vmatpush.msra.mxu2 %v2487_v58  ;;  %1721 = vmatpush.msra.mxu3 %v2486_v47 }
 0xc64   :  { %2383 = vmatmul.msk.f32.vlgmr.msra.gmra.mxu2 %vm286_vm3, %v1591_v0  ;;  %2384 = vmatmul.msk.f32.vlgmr.msra.gmra.mxu3 %vm286_vm3, %v1592_v60 }
 0xc65   :  { %1857 = vmatpush.msrb.mxu3 %v2391_v1 }
 0xc67   :  { %v2583_v53 = vpop.eup %2582  ;;  %1858 = vmatpush.msrb.mxu3 %v2390_v13  ;;  %v2495_v13 = vld [vmem:[%s3438_s7 + $0x2] ss:$0 sm:$0xff] }
 0xc68   :  { %v1595_v5 = vmul.f32 %v2583_v53, %v2569_v29 }
 0xc69   :  { %1859 = vmatpush.msrb.mxu3 %v2389_v14 }
 0xc6b   :  { %1860 = vmatpush.msrb.mxu3 %v2388_v16 }
 0xc73   :  { %v1779_v37 = vpop.permute.xlu0 %1778 }
 0xc74   :  { %1799 = vmatpush.msrb.mxu2 %v1779_v37 }
 0xc75   :  { %2387 = vmatmul.msk.f32.vlgmr.msrb.gmra.mxu2 %vm286_vm3, %v1595_v5 }
 0xcc7   :  { %v1671_v38 = vpop.f32.mrf.mxu1 }
 0xcc8   :  { %1806 = vrot.lane.b32.xlu2 %v1671_v38, %s2670_s15 }
 0xcc9   :  { %v1645_v7 = vpop.f32.mrf.mxu0 }
 0xccf   :  { %v1775_v6 = vpop.f32.mrf.mxu1 }
 0xcd0   :  { %1822 = vrot.lane.b32.xlu2 %v1775_v6, %s2680_s27 }
 0xcd7   :  { %v1749_v11 = vpop.f32.mrf.mxu0 }
 0xce7   :  { %v1697_v9 = vpop.f32.mrf.mxu2  ;;  %v1723_v3 = vpop.f32.mrf.mxu3 }
 0xce8   :  { %1814 = vrot.lane.b32.xlu1 %v1723_v3, %s2679_s26  ;;  %1808 = vrot.lane.b32.xlu0 %v1697_v9, %s2670_s15 }
 0xcf0   :  { %1816 = vrot.lane.b32.xlu1 %v1749_v11, %s2679_s26 }
 0xcf8   :  { %v1801_v12 = vpop.f32.mrf.mxu2 }
 0xcf9   :  { %1824 = vrot.lane.b32.xlu2 %v1801_v12, %s2680_s27 }
 0xd22   :  { %v1807_v56 = vpop.permute.xlu2 %1806 }
 0xd23   :  { %v1828_v19 = vsel %vm286_vm3, %v1619_v2, %v1807_v56 }
 0xd2a   :  { %v1823_v21 = vpop.permute.xlu2 %1822 }
 0xd53   :  { %v1825_v15 = vpop.permute.xlu2 %1824 }
 0xd5a   :  { %v1815_v20 = vpop.permute.xlu1 %1814  ;;  %v1809_v63 = vpop.permute.xlu0 %1808 }
 0xd5b   :  { %v1830_v22 = vsel %vm815_vm4, %v1828_v19, %v1815_v20  ;;  %v1829_v24 = vsel %vm286_vm3, %v1645_v7, %v1809_v63 }
 0xd5c   :  { %v1832_v23 = vsel %vm818_vm5, %v1830_v22, %v1823_v21 }
 0xd5d   :  { %2392 = vmatmul.msk.f32.vlgmr.msrb.gmra.mxu3 %vm145_vm2, %v1832_v23 }
 0xd62   :  { %v1817_v18 = vpop.permute.xlu1 %1816 }
 0xd63   :  { %v1831_v17 = vsel %vm815_vm4, %v1829_v24, %v1817_v18 }
 0xd64   :  { %v1833_v25 = vsel %vm818_vm5, %v1831_v17, %v1825_v15 }
 0xd65   :  { %2393 = vmatmul.msk.f32.gmra.mxu3 %vm145_vm2, %v1833_v25 }
 0xde0   :  { %v1862_v27 = vpop.f32.mrf.mxu3 }
 0xde1   :  { %v3310_v61 = vadd.f32 %v1862_v27, %v3140_v28  ;;  %v2398_v28 = vld [vmem:[%s3436_s5 + $0x38] sm:$0xff] }
 0xde2   :  { %1966 = vmatpush.msrb.mxu0 %v2398_v28  ;;  %v2409_v28 = vld [vmem:[%s3437_s6 + $0x70] sm:$0xff] }
 0xde3   :  { %v1872_v29 = vmul.f32 %v3310_v61, %v3310_v61 }
 0xde4   :  { %1967 = vmatpush.msrb.mxu0 %v2397_v34 }
 0xde5   :  { %v1874_v10 = vsel %vm145_vm2, %v1872_v29, 0.0 }
 0xde6   :  { %1875 = vadd.xlane.f32.xlu0 %v1874_v10 }
 0xde8   :  { %v1865_v31 = vpop.f32.mrf.mxu3 }
 0xde9   :  { %v3316_v32 = vadd.f32 %v1865_v31, %v3147_v46  ;;  %v2396_v46 = vld [vmem:[%s3436_s5 + $0x28] sm:$0xff]  ;;  %v2410_v31 = vld [vmem:[%s3437_s6 + $0x78] sm:$0xff] }
 0xdea   :  { %1968 = vmatpush.msrb.mxu0 %v2396_v46  ;;  %2088 = vmatpush.msra.mxu1 %v2410_v31 }
 0xdeb   :  { %v1873_v8 = vmul.f32 %v3316_v32, %v3316_v32 }
 0xdec   :  { %1969 = vmatpush.msrb.mxu0 %v2395_v36  ;;  %2089 = vmatpush.msra.mxu1 %v2409_v28  ;;  %v2408_v36 = vld [vmem:[%s3437_s6 + $0x68] sm:$0xff] }
 0xded   :  { %v1877_v42 = vsel %vm145_vm2, %v1873_v8, 0.0 }
 0xdee   :  { %1878 = vadd.xlane.f32.xlu1 %v1877_v42  ;;  %2090 = vmatpush.msra.mxu1 %v2408_v36 }
 0xe59   :  { %v1876_v35 = vpop.xlane.xlu0 %1875 }
 0xe5a   :  { %v1880_v48 = vmul.f32 %v1876_v35, %v3031_v4 }
 0xe5c   :  { %2584 = vrsqrt.f32 %v1880_v48  ;;  %vm1889_vm3 = vcmp.eq.f32.partialorder %v1880_v48, inf  ;;  %v1892_v59 = vand.u32 2147483648, %v1880_v48  ;;  %vm1891_vm4 = vcmp.eq.f32.partialorder %v1880_v48, 0.0 }
 0xe61   :  { %v1879_v39 = vpop.xlane.xlu1 %1878 }
 0xe62   :  { %v2585_v26 = vpop.eup %2584  ;;  %v1881_v33 = vmul.f32 %v1879_v39, %v3031_v4 }
 0xe63   :  { %v1883_v40 = vmul.f32 %v2585_v26, %v1880_v48 }
 0xe64   :  { %2586 = vrsqrt.f32 %v1881_v33  ;;  %vm1901_vm5 = vcmp.eq.f32.partialorder %v1881_v33, inf  ;;  %v1904_v0 = vand.u32 2147483648, %v1881_v33  ;;  %vm1903_vm1 = vcmp.eq.f32.partialorder %v1881_v33, 0.0 }
 0xe65   :  { %v1884_v41 = vmul.f32 %v2585_v26, %v1883_v40 }
 0xe67   :  { %v1885_v43 = vmul.f32 0.5, %v1884_v41 }
 0xe69   :  { %v1886_v44 = vsub.f32 1.5, %v1885_v43 }
 0xe6a   :  { %v2587_v30 = vpop.eup %2586 }
 0xe6b   :  { %v1887_v57 = vmul.f32 %v2585_v26, %v1886_v44  ;;  %v1895_v49 = vmul.f32 %v2587_v30, %v1881_v33  ;;  %v2406_v44 = vld [vmem:[%s3437_s6 + $0x58] sm:$0xff] }
 0xe6d   :  { %v1888_v50 = vmul.f32 %v1887_v57, %v1880_v48  ;;  %v1896_v52 = vmul.f32 %v2587_v30, %v1895_v49 }
 0xe6f   :  { %v1890_v62 = vsel %vm1889_vm3, %v1880_v48, %v1888_v50  ;;  %v1897_v45 = vmul.f32 0.5, %v1896_v52  ;;  %v2405_v50 = vld [vmem:[%s3437_s6 + $0x50] sm:$0xff] }
 0xe70   :  { %v1893_v54 = vsel %vm1891_vm4, %v1892_v59, %v1890_v62 }
 0xe71   :  { %v1906_v55 = vadd.f32 1e-08, %v1893_v54  ;;  %v1898_v58 = vsub.f32 1.5, %v1897_v45  ;;  %v2404_v54 = vld [vmem:[%s3437_s6 + $0x48] sm:$0xff] }
 0xe73   :  { %2588 = vrcp.f32 %v1906_v55  ;;  %v1899_v47 = vmul.f32 %v2587_v30, %v1898_v58  ;;  %v1919_v2 = vand.u32 2147483648, %v1906_v55  ;;  %v1917_v9 = vand.u32 2147483647, %v1906_v55 }
 0xe74   :  { %vm1913_vm7 = vweird.f32 %v1906_v55 }
 0xe75   :  { %v1900_v60 = vmul.f32 %v1899_v47, %v1881_v33  ;;  %v1920_v12 = vor.u32 1.1754944e-38, %v1919_v2  ;;  %vm1918_vm9 = vcmp.eq.f32.partialorder %v1917_v9, 8.507059e+37 }
 0xe77   :  { %v1902_v51 = vsel %vm1901_vm5, %v1881_v33, %v1900_v60  ;;  %v2407_v33 = vld [vmem:[%s3437_s6 + $0x60] sm:$0xff] }
 0xe78   :  { %v1905_v53 = vsel %vm1903_vm1, %v1904_v0, %v1902_v51  ;;  %2091 = vmatpush.msra.mxu1 %v2407_v33  ;;  %v2403_v60 = vld [vmem:[%s3437_s6 + $0x40] sm:$0xff] }
 0xe79   :  { %v2589_v5 = vpop.eup %2588  ;;  %v1907_v37 = vadd.f32 1e-08, %v1905_v53 }
 0xe7a   :  { %v1909_v38 = vmul.f32 %v2589_v5, %v1906_v55  ;;  %vm1914_vm6 = vweird.f32 %v2589_v5  ;;  %2092 = vmatpush.msra.mxu1 %v2406_v44 }
 0xe7b   :  { %2590 = vrcp.f32 %v1907_v37  ;;  %vm1915_vm8 = vmor %vm1913_vm7, %vm1914_vm6  ;;  %v1933_v20 = vand.u32 2147483648, %v1907_v37  ;;  %v1931_v23 = vand.u32 2147483647, %v1907_v37  ;;  %vm1927_vm11 = vweird.f32 %v1907_v37 }
 0xe7c   :  { %v1910_v6 = vsub.f32 1.0, %v1909_v38  ;;  %2093 = vmatpush.msra.mxu1 %v2405_v50 }
 0xe7d   :  { %v1934_v24 = vor.u32 1.1754944e-38, %v1933_v20  ;;  %vm1932_vm14 = vcmp.eq.f32.partialorder %v1931_v23, 8.507059e+37 }
 0xe7e   :  { %v1911_v7 = vmul.f32 %v2589_v5, %v1910_v6  ;;  %2094 = vmatpush.msra.mxu1 %v2404_v54 }
 0xe80   :  { %v1912_v3 = vadd.f32 %v2589_v5, %v1911_v7  ;;  %2095 = vmatpush.msra.mxu1 %v2403_v60 }
 0xe81   :  { %v2591_v11 = vpop.eup %2590 }
 0xe82   :  { %v1916_v1 = vsel %vm1915_vm8, %v2589_v5, %v1912_v3  ;;  %v1923_v14 = vmul.f32 %v2591_v11, %v1907_v37  ;;  %vm1928_vm10 = vweird.f32 %v2591_v11 }
 0xe83   :  { %v1921_v16 = vsel %vm1918_vm9, %v1920_v12, %v1916_v1  ;;  %vm1929_vm12 = vmor %vm1927_vm11, %vm1928_vm10 }
 0xe84   :  { %v1936_v56 = vmul.f32 %v1921_v16, %v3310_v61  ;;  %v1924_v19 = vsub.f32 1.0, %v1923_v14 }
 0xe86   :  { %v3339_v21 = vmul.f32 %v2495_v13, %v1936_v56  ;;  %v1925_v22 = vmul.f32 %v2591_v11, %v1924_v19 }
 0xe88   :  { %2399 = vmatmul.msk.f32.vlgmr.msrb.gmra.mxu0 %vm145_vm2, %v3339_v21  ;;  %v1926_v63 = vadd.f32 %v2591_v11, %v1925_v22 }
 0xe8a   :  { %v1930_v18 = vsel %vm1929_vm12, %v2591_v11, %v1926_v63 }
 0xe8b   :  { %v1935_v15 = vsel %vm1932_vm14, %v1934_v24, %v1930_v18 }
 0xe8c   :  { %v1937_v17 = vmul.f32 %v1935_v15, %v3316_v32 }
 0xe8e   :  { %v3344_v25 = vmul.f32 %v2495_v13, %v1937_v17 }
 0xe90   :  { %2400 = vmatmul.msk.f32.gmra.mxu0 %vm145_vm2, %v3344_v25 }
 0xf05   :  { %v3348_v27 = vpop.f32.mrf.mxu0 }
 0xf06   :  { %v3351_v61 = vmul.f32 0.70710677, %v3348_v27 }
 0xf08   :  { %v1981_v29 = vmul.f32 %v3351_v61, %v3351_v61 }
 0xf0a   :  { %v1982_v10 = vmin.f32 %v1981_v29, 16.0 }
 0xf0c   :  { %v1983_v8 = vmul.f32 2.1237322e-06, %v1982_v10  ;;  %v1994_v32 = vmul.f32 3.8918573e-05, %v1982_v10 }
 0xf0d   :  { %v3358_v42 = vpop.f32.mrf.mxu0 }
 0xf0e   :  { %v1984_v34 = vadd.f32 0.00028619796, %v1983_v8  ;;  %v1995_v46 = vadd.f32 0.001143296, %v1994_v32  ;;  %v3364_v35 = vmul.f32 0.70710677, %v3358_v42 }
 0xf10   :  { %v1985_v48 = vmul.f32 %v1984_v34, %v1982_v10  ;;  %v1996_v39 = vmul.f32 %v1995_v46, %v1982_v10  ;;  %v2021_v26 = vmul.f32 %v3364_v35, %v3364_v35 }
 0xf12   :  { %v1997_v40 = vadd.f32 0.014752088, %v1996_v39  ;;  %v1986_v41 = vadd.f32 0.0036580483, %v1985_v48  ;;  %v2022_v43 = vmin.f32 %v2021_v26, 16.0 }
 0xf14   :  { %v1998_v30 = vmul.f32 %v1997_v40, %v1982_v10  ;;  %v2023_v57 = vmul.f32 2.1237322e-06, %v2022_v43  ;;  %v2034_v49 = vmul.f32 3.8918573e-05, %v2022_v43  ;;  %v1987_v59 = vmul.f32 %v1986_v41, %v1982_v10 }
 0xf15   :  { %v1977_v41 = vmul.f32 0.5, %v3348_v27 }
 0xf16   :  { %v1999_v52 = vadd.f32 0.112945676, %v1998_v30  ;;  %v2024_v62 = vadd.f32 0.00028619796, %v2023_v57  ;;  %v2035_v45 = vadd.f32 0.001143296, %v2034_v49 }
 0xf17   :  { %v1988_v51 = vadd.f32 0.05243302, %v1987_v59 }
 0xf18   :  { %v2000_v55 = vmul.f32 %v1999_v52, %v1982_v10  ;;  %v2025_v58 = vmul.f32 %v2024_v62, %v2022_v43  ;;  %v2036_v47 = vmul.f32 %v2035_v45, %v2022_v43  ;;  %v1978_v62 = vmul.f32 0.5, %v3358_v42 }
 0xf19   :  { %v1989_v2 = vmul.f32 %v1988_v51, %v1982_v10 }
 0xf1a   :  { %v2001_v0 = vadd.f32 0.4994258, %v2000_v55  ;;  %v2037_v53 = vadd.f32 0.014752088, %v2036_v47  ;;  %v2026_v37 = vadd.f32 0.0036580483, %v2025_v58 }
 0xf1b   :  { %v1990_v11 = vadd.f32 0.18741608, %v1989_v2 }
 0xf1c   :  { %v2002_v5 = vmul.f32 %v2001_v0, %v1982_v10  ;;  %v2038_v38 = vmul.f32 %v2037_v53, %v2022_v43  ;;  %v2027_v9 = vmul.f32 %v2026_v37, %v2022_v43 }
 0xf1d   :  { %v1991_v16 = vmul.f32 %v1990_v11, %v1982_v10 }
 0xf1e   :  { %v2003_v6 = vadd.f32 1.0, %v2002_v5  ;;  %v2039_v7 = vadd.f32 0.112945676, %v2038_v38  ;;  %v2028_v1 = vadd.f32 0.05243302, %v2027_v9 }
 0xf1f   :  { %v1992_v63 = vadd.f32 1.1283791, %v1991_v16 }
 0xf20   :  { %2592 = vrcp.f32 %v2003_v6  ;;  %v2040_v3 = vmul.f32 %v2039_v7, %v2022_v43  ;;  %v2029_v20 = vmul.f32 %v2028_v1, %v2022_v43  ;;  %v2015_v23 = vand.u32 2147483648, %v2003_v6 }
 0xf21   :  { %v2013_v18 = vand.u32 2147483647, %v2003_v6  ;;  %vm2009_vm0 = vweird.f32 %v2003_v6  ;;  %v1993_v8 = vmul.f32 %v1992_v63, %v3351_v61 }
 0xf22   :  { %v2041_v12 = vadd.f32 0.4994258, %v2040_v3  ;;  %v2030_v15 = vadd.f32 0.18741608, %v2029_v20  ;;  %v2016_v29 = vor.u32 1.1754944e-38, %v2015_v23 }
 0xf23   :  { %vm2014_vm4 = vcmp.eq.f32.partialorder %v2013_v18, 8.507059e+37 }
 0xf24   :  { %v2042_v13 = vmul.f32 %v2041_v12, %v2022_v43  ;;  %v2031_v28 = vmul.f32 %v2030_v15, %v2022_v43 }
 0xf26   :  { %v2593_v14 = vpop.eup %2592  ;;  %v2043_v19 = vadd.f32 1.0, %v2042_v13  ;;  %v2032_v26 = vadd.f32 1.1283791, %v2031_v28 }
 0xf27   :  { %v2005_v56 = vmul.f32 %v2593_v14, %v2003_v6  ;;  %vm2010_vm15 = vweird.f32 %v2593_v14 }
 0xf28   :  { %2594 = vrcp.f32 %v2043_v19  ;;  %vm2011_vm3 = vmor %vm2009_vm0, %vm2010_vm15  ;;  %v2055_v39 = vand.u32 2147483648, %v2043_v19  ;;  %v2053_v40 = vand.u32 2147483647, %v2043_v19  ;;  %vm2049_vm1 = vweird.f32 %v2043_v19 }
 0xf29   :  { %v2006_v22 = vsub.f32 1.0, %v2005_v56  ;;  %v2033_v49 = vmul.f32 %v2032_v26, %v3364_v35 }
 0xf2a   :  { %v2056_v61 = vor.u32 1.1754944e-38, %v2055_v39  ;;  %vm2054_vm7 = vcmp.eq.f32.partialorder %v2053_v40, 8.507059e+37 }
 0xf2b   :  { %v2007_v24 = vmul.f32 %v2593_v14, %v2006_v22 }
 0xf2d   :  { %v2008_v17 = vadd.f32 %v2593_v14, %v2007_v24 }
 0xf2e   :  { %v2595_v31 = vpop.eup %2594 }
 0xf2f   :  { %v2012_v32 = vsel %vm2011_vm3, %v2593_v14, %v2008_v17  ;;  %v2045_v34 = vmul.f32 %v2595_v31, %v2043_v19  ;;  %vm2050_vm5 = vweird.f32 %v2595_v31 }
 0xf30   :  { %v2017_v10 = vsel %vm2014_vm4, %v2016_v29, %v2012_v32  ;;  %vm2051_vm6 = vmor %vm2049_vm1, %vm2050_vm5 }
 0xf31   :  { %v2018_v46 = vmul.f32 %v2017_v10, %v1993_v8  ;;  %v2046_v36 = vsub.f32 1.0, %v2045_v34 }
 0xf33   :  { %v2401_v48 = vclamps-f32 %v2018_v46, 1.0  ;;  %v2047_v33 = vmul.f32 %v2595_v31, %v2046_v36  ;;  %v2496_v36 = vld [vmem:[%s3438_s7 + $0x3] ss:$0 sm:$0xff] }
 0xf35   :  { %v2061_v44 = vadd.f32 1.0, %v2401_v48  ;;  %v2048_v30 = vadd.f32 %v2595_v31, %v2047_v33 }
 0xf37   :  { %v2063_v57 = vmul.f32 %v2061_v44, %v1977_v41  ;;  %v2052_v43 = vsel %vm2051_vm6, %v2595_v31, %v2048_v30 }
 0xf38   :  { %v2057_v50 = vsel %vm2054_vm7, %v2056_v61, %v2052_v43 }
 0xf39   :  { %2411 = vmatmul.msk.f32.vlgmr.msra.gmra.mxu1 %vm1064_vm13, %v2063_v57  ;;  %v2058_v52 = vmul.f32 %v2057_v50, %v2033_v49 }
 0xf3b   :  { %v2402_v59 = vclamps-f32 %v2058_v52, 1.0 }
 0xf3d   :  { %v2062_v45 = vadd.f32 1.0, %v2402_v59 }
 0xf3f   :  { %v2064_v54 = vmul.f32 %v2062_v45, %v1978_v62 }
 0xf41   :  { %2412 = vmatmul.msk.f32.gmra.mxu1 %vm1064_vm13, %v2064_v54 }
 0xfb6   :  { %v2097_v27 = vpop.f32.mrf.mxu1 }
 0xfb7   :  { %v2103_v55 = vadd.f32 %v2097_v27, %v3339_v21  ;;  %v2254_v27 = vld [vmem:[#allocation2 + $0x18] sm:$0xff] }
 0xfb8   :  { %2273 = vmatpush.msra.mxu2 %v2254_v27 }
 0xfb9   :  { %v2107_v58 = vmul.f32 %v2103_v55, %v2103_v55 }
 0xfbb   :  { %v2109_v47 = vsel %vm145_vm2, %v2107_v58, 0.0  ;;  %v2252_v58 = vld [vmem:[#allocation2 + $0x8] sm:$0xff] }
 0xfbc   :  { %2110 = vadd.xlane.f32.xlu2 %v2109_v47 }
 0xfbe   :  { %v2100_v35 = vpop.f32.mrf.mxu1 }
 0xfbf   :  { %v3395_v60 = vadd.f32 %v2100_v35, %v3344_v25 }
 0xfc1   :  { %v2108_v0 = vmul.f32 %v3395_v60, %v3395_v60 }
 0xfc3   :  { %v2112_v42 = vsel %vm145_vm2, %v2108_v0, 0.0  ;;  %v2251_v0 = vld [vmem:[#allocation2] sm:$0xff] }
 0xfc4   :  { %2113 = vadd.xlane.f32.xlu0 %v2112_v42 }
0x102f   :  { %v2111_v51 = vpop.xlane.xlu2 %2110 }
0x1030   :  { %v2115_v53 = vmul.f32 %v2111_v51, %v3031_v4 }
0x1032   :  { %2596 = vrsqrt.f32 %v2115_v53  ;;  %vm2124_vm13 = vcmp.eq.f32.partialorder %v2115_v53, inf  ;;  %v2127_v12 = vand.u32 2147483648, %v2115_v53  ;;  %vm2126_vm8 = vcmp.eq.f32.partialorder %v2115_v53, 0.0 }
0x1037   :  { %v2114_v21 = vpop.xlane.xlu0 %2113 }
0x1038   :  { %v2597_v5 = vpop.eup %2596  ;;  %v2116_v38 = vmul.f32 %v2114_v21, %v3031_v4 }
0x1039   :  { %v2118_v37 = vmul.f32 %v2597_v5, %v2115_v53 }
0x103a   :  { %2598 = vrsqrt.f32 %v2116_v38  ;;  %vm2136_vm9 = vcmp.eq.f32.partialorder %v2116_v38, inf  ;;  %v2139_v23 = vand.u32 2147483648, %v2116_v38  ;;  %vm2138_vm10 = vcmp.eq.f32.partialorder %v2116_v38, 0.0 }
0x103b   :  { %v2119_v6 = vmul.f32 %v2597_v5, %v2118_v37 }
0x103d   :  { %v2120_v2 = vmul.f32 0.5, %v2119_v6 }
0x103f   :  { %v2121_v25 = vsub.f32 1.5, %v2120_v2 }
0x1040   :  { %v2599_v7 = vpop.eup %2598 }
0x1041   :  { %v2122_v9 = vmul.f32 %v2597_v5, %v2121_v25  ;;  %v2130_v3 = vmul.f32 %v2599_v7, %v2116_v38 }
0x1043   :  { %v2123_v11 = vmul.f32 %v2122_v9, %v2115_v53  ;;  %v2131_v1 = vmul.f32 %v2599_v7, %v2130_v3 }
0x1045   :  { %v2125_v13 = vsel %vm2124_vm13, %v2115_v53, %v2123_v11  ;;  %v2132_v14 = vmul.f32 0.5, %v2131_v1 }
0x1046   :  { %v2128_v16 = vsel %vm2126_vm8, %v2127_v12, %v2125_v13 }
0x1047   :  { %v2141_v56 = vadd.f32 1e-08, %v2128_v16  ;;  %v2133_v19 = vsub.f32 1.5, %v2132_v14 }
0x1049   :  { %2600 = vrcp.f32 %v2141_v56  ;;  %v2134_v20 = vmul.f32 %v2599_v7, %v2133_v19  ;;  %v2154_v31 = vand.u32 2147483648, %v2141_v56  ;;  %v2152_v32 = vand.u32 2147483647, %v2141_v56 }
0x104a   :  { %vm2148_vm12 = vweird.f32 %v2141_v56 }
0x104b   :  { %v2135_v22 = vmul.f32 %v2134_v20, %v2116_v38  ;;  %v2155_v28 = vor.u32 1.1754944e-38, %v2154_v31  ;;  %vm2153_vm15 = vcmp.eq.f32.partialorder %v2152_v32, 8.507059e+37  ;;  %v2497_v32 = vld [vmem:[%s3438_s7 + $0x4] ss:$0 sm:$0xff]  ;;  %s2682_s7 = smov [#allocation5]  }
0x104c   :  { %s2290_s12 = sshll.u32 %s2682_s7, 4  ;;  %s2291_s12 = int_to_ptr.vmem [resolvable:$true] %s2290_s12 }
0x104d   :  { %v2137_v63 = vsel %vm2136_vm9, %v2116_v38, %v2135_v22 }
0x104e   :  { %v2140_v18 = vsel %vm2138_vm10, %v2139_v23, %v2137_v63 }
0x104f   :  { %v2601_v24 = vpop.eup %2600  ;;  %v2142_v17 = vadd.f32 1e-08, %v2140_v18 }
0x1050   :  { %v2144_v15 = vmul.f32 %v2601_v24, %v2141_v56  ;;  %vm2149_vm11 = vweird.f32 %v2601_v24 }
0x1051   :  { %2602 = vrcp.f32 %v2142_v17  ;;  %vm2150_vm14 = vmor %vm2148_vm12, %vm2149_vm11  ;;  %v2168_v41 = vand.u32 2147483648, %v2142_v17  ;;  %v2166_v30 = vand.u32 2147483647, %v2142_v17  ;;  %vm2162_vm3 = vweird.f32 %v2142_v17 }
0x1052   :  { %v2145_v29 = vsub.f32 1.0, %v2144_v15 }
0x1053   :  { %v2169_v43 = vor.u32 1.1754944e-38, %v2168_v41  ;;  %vm2167_vm5 = vcmp.eq.f32.partialorder %v2166_v30, 8.507059e+37 }
0x1054   :  { %v2146_v8 = vmul.f32 %v2601_v24, %v2145_v29 }
0x1056   :  { %v2147_v10 = vadd.f32 %v2601_v24, %v2146_v8 }
0x1057   :  { %v2603_v34 = vpop.eup %2602 }
0x1058   :  { %v2151_v46 = vsel %vm2150_vm14, %v2601_v24, %v2147_v10  ;;  %v2158_v39 = vmul.f32 %v2603_v34, %v2142_v17  ;;  %vm2163_vm0 = vweird.f32 %v2603_v34 }
0x1059   :  { %v2156_v48 = vsel %vm2153_vm15, %v2155_v28, %v2151_v46  ;;  %vm2164_vm4 = vmor %vm2162_vm3, %vm2163_vm0 }
0x105a   :  { %v2171_v26 = vmul.f32 %v2156_v48, %v2103_v55  ;;  %v2159_v33 = vsub.f32 1.0, %v2158_v39  ;;  %v2253_v55 = vld [vmem:[#allocation2 + $0x10] sm:$0xff] }
0x105b   :  { %2274 = vmatpush.msra.mxu2 %v2253_v55 }
0x105c   :  { %v3405_v40 = vmul.f32 %v2496_v36, %v2171_v26  ;;  %v2160_v44 = vmul.f32 %v2603_v34, %v2159_v33 }
0x105d   :  { %2275 = vmatpush.msra.mxu2 %v2252_v58 }
0x105e   :  { %v2180_v57 = vmul.f32 %v3405_v40, %v3405_v40  ;;  %v2161_v61 = vadd.f32 %v2603_v34, %v2160_v44 }
0x105f   :  { %2276 = vmatpush.msra.mxu2 %v2251_v0 }
0x1060   :  { %v2182_v49 = vsel %vm145_vm2, %v2180_v57, 0.0  ;;  %v2165_v50 = vsel %vm2164_vm4, %v2603_v34, %v2161_v61 }
0x1061   :  { %2183 = vadd.xlane.f32.xlu1 %v2182_v49  ;;  %v2170_v52 = vsel %vm2167_vm5, %v2169_v43, %v2165_v50 }
0x1062   :  { %v2172_v59 = vmul.f32 %v2170_v52, %v3395_v60 }
0x1064   :  { %v3411_v62 = vmul.f32 %v2496_v36, %v2172_v59 }
0x1066   :  { %v2181_v45 = vmul.f32 %v3411_v62, %v3411_v62 }
0x1068   :  { %v2185_v54 = vsel %vm145_vm2, %v2181_v45, 0.0 }
0x1069   :  { %2186 = vadd.xlane.f32.xlu2 %v2185_v54 }
0x10d4   :  { %v2184_v47 = vpop.xlane.xlu1 %2183 }
0x10d5   :  { %v2188_v35 = vmul.f32 %v2184_v47, %v3031_v4 }
0x10d7   :  { %2604 = vrsqrt.f32 %v2188_v35  ;;  %vm2197_vm1 = vcmp.eq.f32.partialorder %v2188_v35, inf  ;;  %v2200_v7 = vand.u32 2147483648, %v2188_v35  ;;  %vm2199_vm6 = vcmp.eq.f32.partialorder %v2188_v35, 0.0 }
0x10dc   :  { %v2187_v42 = vpop.xlane.xlu2 %2186 }
0x10dd   :  { %v2605_v60 = vpop.eup %2604  ;;  %v2189_v53 = vmul.f32 %v2187_v42, %v3031_v4 }
0x10de   :  { %v2191_v51 = vmul.f32 %v2605_v60, %v2188_v35 }
0x10df   :  { %2606 = vrsqrt.f32 %v2189_v53  ;;  %vm2209_vm7 = vcmp.eq.f32.partialorder %v2189_v53, inf  ;;  %v2212_v16 = vand.u32 2147483648, %v2189_v53  ;;  %vm2211_vm13 = vcmp.eq.f32.partialorder %v2189_v53, 0.0 }
0x10e0   :  { %v2192_v5 = vmul.f32 %v2605_v60, %v2191_v51 }
0x10e2   :  { %v2193_v21 = vmul.f32 0.5, %v2192_v5 }
0x10e4   :  { %v2194_v37 = vsub.f32 1.5, %v2193_v21 }
0x10e5   :  { %v2607_v38 = vpop.eup %2606 }
0x10e6   :  { %v2195_v6 = vmul.f32 %v2605_v60, %v2194_v37  ;;  %v2203_v2 = vmul.f32 %v2607_v38, %v2189_v53 }
0x10e8   :  { %v2196_v25 = vmul.f32 %v2195_v6, %v2188_v35  ;;  %v2204_v9 = vmul.f32 %v2607_v38, %v2203_v2 }
0x10ea   :  { %v2198_v3 = vsel %vm2197_vm1, %v2188_v35, %v2196_v25  ;;  %v2205_v12 = vmul.f32 0.5, %v2204_v9 }
0x10eb   :  { %v2201_v11 = vsel %vm2199_vm6, %v2200_v7, %v2198_v3 }
0x10ec   :  { %v2214_v1 = vadd.f32 1e-08, %v2201_v11  ;;  %v2206_v13 = vsub.f32 1.5, %v2205_v12 }
0x10ee   :  { %2608 = vrcp.f32 %v2214_v1  ;;  %v2207_v14 = vmul.f32 %v2607_v38, %v2206_v13  ;;  %v2227_v24 = vand.u32 2147483648, %v2214_v1  ;;  %v2225_v15 = vand.u32 2147483647, %v2214_v1 }
0x10ef   :  { %vm2221_vm9 = vweird.f32 %v2214_v1 }
0x10f0   :  { %v2208_v4 = vmul.f32 %v2207_v14, %v2189_v53  ;;  %v2228_v29 = vor.u32 1.1754944e-38, %v2227_v24  ;;  %vm2226_vm11 = vcmp.eq.f32.partialorder %v2225_v15, 8.507059e+37 }
0x10f2   :  { %v2210_v56 = vsel %vm2209_vm7, %v2189_v53, %v2208_v4 }
0x10f3   :  { %v2213_v20 = vsel %vm2211_vm13, %v2212_v16, %v2210_v56 }
0x10f4   :  { %v2609_v19 = vpop.eup %2608  ;;  %v2215_v23 = vadd.f32 1e-08, %v2213_v20 }
0x10f5   :  { %v2217_v22 = vmul.f32 %v2609_v19, %v2214_v1  ;;  %vm2222_vm8 = vweird.f32 %v2609_v19 }
0x10f6   :  { %2610 = vrcp.f32 %v2215_v23  ;;  %vm2223_vm10 = vmor %vm2221_vm9, %vm2222_vm8  ;;  %v2241_v48 = vand.u32 2147483648, %v2215_v23  ;;  %v2239_v26 = vand.u32 2147483647, %v2215_v23  ;;  %vm2235_vm14 = vweird.f32 %v2215_v23 }
0x10f7   :  { %v2218_v63 = vsub.f32 1.0, %v2217_v22 }
0x10f8   :  { %v2242_v41 = vor.u32 1.1754944e-38, %v2241_v48  ;;  %vm2240_vm0 = vcmp.eq.f32.partialorder %v2239_v26, 8.507059e+37 }
0x10f9   :  { %v2219_v18 = vmul.f32 %v2609_v19, %v2218_v63 }
0x10fb   :  { %v2220_v17 = vadd.f32 %v2609_v19, %v2219_v18 }
0x10fc   :  { %v2611_v31 = vpop.eup %2610 }
0x10fd   :  { %v2224_v8 = vsel %vm2223_vm10, %v2609_v19, %v2220_v17  ;;  %v2231_v28 = vmul.f32 %v2611_v31, %v2215_v23  ;;  %vm2236_vm12 = vweird.f32 %v2611_v31 }
0x10fe   :  { %v2229_v10 = vsel %vm2226_vm11, %v2228_v29, %v2224_v8  ;;  %vm2237_vm15 = vmor %vm2235_vm14, %vm2236_vm12 }
0x10ff   :  { %v2244_v34 = vmul.f32 %v2229_v10, %v3405_v40  ;;  %v2232_v46 = vsub.f32 1.0, %v2231_v28 }
0x1101   :  { %v2249_v36 = vmul.f32 %v2497_v32, %v2244_v34  ;;  %v2233_v39 = vmul.f32 %v2611_v31, %v2232_v46 }
0x1103   :  { %2415 = vmatmul.msk.f32.vlgmr.msra.gmra.mxu2 %vm145_vm2, %v2249_v36  ;;  %v2234_v33 = vadd.f32 %v2611_v31, %v2233_v39 }
0x1105   :  { %v2238_v44 = vsel %vm2237_vm15, %v2611_v31, %v2234_v33 }
0x1106   :  { %v2243_v30 = vsel %vm2240_vm0, %v2242_v41, %v2238_v44 }
0x1107   :  { %v2245_v57 = vmul.f32 %v2243_v30, %v3411_v62 }
0x1109   :  { %v2250_v61 = vmul.f32 %v2497_v32, %v2245_v57 }
0x110b   :  { %2416 = vmatmul.msk.f32.gmra.mxu2 %vm145_vm2, %v2250_v61 }
0x1186   :  { %v2278_v40 = vpop.f32.mrf.mxu2 }
0x1187   :  { %2284 = vst [vmem:[#allocation5] sm:$0xff] %v2278_v40 }
0x118e   :  { %v2281_v49 = vpop.f32.mrf.mxu2 }
0x118f   :  { %2285 = vst [vmem:[#allocation5 + $0x8] sm:$0xff] %v2281_v49 }
0x1190   :  { %2298 = dma.vmem_to_hbm [thread:$0]  %s2291_s12, 256, %s2293_s0, [#allocation4], %s2669_s14, %s2669_s14, %s2670_s15  }
0x1191   :  { %2666 = dma.done.wait [#allocation4], 256  }
0x1192   :  { %2667 = vsyncadd [#allocation4], 4294967040 }
0x1193   :  { %2303 = vsyncpa [#allocation3], 1 }
0x1194   :  { %2304 = vsyncpa [#allocation4], 1 }

</bundles_post_ra>
